<compile_context>
chip_gen: v7x
topology: tpu7x:2x2x1
jax: 0.10.0
libtpu: 0.0.40
codegen_flags: <defaults>
</compile_context>

<pallas_src>
import math

import jax
import jax.numpy as jnp
from jax.experimental import pallas as pl
from jax.experimental.pallas import tpu as pltpu


# ------------------------------- Pallas kernel -------------------------------

def make_encoder_kernel(batch_block, seq_len, d_model, num_heads, num_layers,
                        fused_heads):
    Bb, S, D, H, L = batch_block, seq_len, d_model, num_heads, num_layers
    Dh = D // H
    N = Bb * S
    scale = 1.0 / math.sqrt(Dh)
    bf16 = jnp.bfloat16
    f32 = jnp.float32

    def kernel(x_ref, neg_ref,
               wq_ref, bq_ref, wk_ref, bk_ref, wv_ref, bv_ref, wo_ref, bo_ref,
               g1_ref, be1_ref, w1_ref, bf1_ref, w2_ref, bf2_ref,
               g2_ref, be2_ref,
               o_ref):
        l = pl.program_id(1)

        # Layer 0: seed the VMEM-resident activation (o_ref is the layer carry).
        @pl.when(l == 0)
        def _():
            o_ref[...] = x_ref[...]

        x2d = o_ref[...]                          # (N, D) f32
        x_bf = x2d.astype(bf16)
        neg = neg_ref[...]                        # (Bb, 1, S) additive key mask

        def proj(w_ref, b_ref):                   # 2-D MXU matmul, f32 accumulate
            return (jnp.dot(x_bf, w_ref[0], preferred_element_type=f32)
                    + b_ref[0])

        q = proj(wq_ref, bq_ref)                  # (N, D) f32
        k = proj(wk_ref, bk_ref)
        v = proj(wv_ref, bv_ref)

        if fused_heads:
            # --- all heads in one batched einsum (b and h are batch dims) ----
            q4 = q.reshape(Bb, S, H, Dh).astype(bf16)
            k4 = k.reshape(Bb, S, H, Dh).astype(bf16)
            v4 = v.reshape(Bb, S, H, Dh).astype(bf16)
            sc = jnp.einsum('bqhd,bkhd->bhqk', q4, k4,
                            preferred_element_type=f32) * scale
            sc = sc + neg[:, None, :, :]          # (Bb,1,1,S) over heads/queries
            m = jnp.max(sc, axis=-1, keepdims=True)
            p = jnp.exp(sc - m)
            p = p * pl.reciprocal(jnp.sum(p, axis=-1, keepdims=True),
                                  approx=True)
            ctx = jnp.einsum('bhqk,bkhd->bqhd', p.astype(bf16), v4,
                             preferred_element_type=f32)
            heads2d = ctx.reshape(N, D)
            attn = (jnp.dot(heads2d.astype(bf16), wo_ref[0],
                            preferred_element_type=f32) + bo_ref[0])
        else:
            # --- fallback: per-head loop with lane slices (known-good path) --
            q3 = q.reshape(Bb, S, D)
            k3 = k.reshape(Bb, S, D)
            v3 = v.reshape(Bb, S, D)
            wo_f = wo_ref[0].astype(f32)          # (D, D)
            neg_b = jnp.broadcast_to(neg, (Bb, S, S))   # hoisted out of the loop
            acc = jnp.zeros((Bb, S, D), f32)
            for h in range(H):                    # static unroll (H small)
                sl = slice(h * Dh, (h + 1) * Dh)
                sc = jnp.einsum('bqd,bkd->bqk', q3[:, :, sl], k3[:, :, sl],
                                preferred_element_type=f32) * scale
                sc = sc + neg_b
                m = jnp.max(sc, axis=-1, keepdims=True)
                p = jnp.exp(sc - m)
                p = p * pl.reciprocal(jnp.sum(p, axis=-1, keepdims=True),
                                      approx=True)
                ho = jnp.einsum('bqk,bkd->bqd', p, v3[:, :, sl],
                                preferred_element_type=f32)
                acc = acc + jnp.einsum('bsd,de->bse', ho, wo_f[sl, :],
                                       preferred_element_type=f32)
            attn = acc.reshape(N, D) + bo_ref[0]

        def layernorm(vv, g_ref, b_ref):          # f32 statistics
            mu = jnp.mean(vv, axis=-1, keepdims=True)
            var = jnp.mean((vv - mu) ** 2, axis=-1, keepdims=True)
            return (vv - mu) * jax.lax.rsqrt(var + 1e-5) * g_ref[0] + b_ref[0]

        # dropout is identity in eval mode
        x1 = layernorm(x2d + attn, g1_ref, be1_ref)

        h1 = jnp.dot(x1.astype(bf16), w1_ref[0],
                     preferred_element_type=f32) + bf1_ref[0]
        h1 = jnp.maximum(h1, 0.0)
        ff = jnp.dot(h1.astype(bf16), w2_ref[0],
                     preferred_element_type=f32) + bf2_ref[0]

        o_ref[...] = layernorm(x1 + ff, g2_ref, be2_ref)

    return kernel


def transformer_encoder_pallas(x_bsd, keep_mask, stacked, *, num_heads,
                               batch_block=None, fused_heads=True):
    """x_bsd: (B,S,D) f32 embedded+PE input; keep_mask: (B,1,S) f32 (1=attend).

    stacked: dict of per-layer parameters stacked on a leading L axis
             (matmul weights in bf16, biases / LN params in f32).
    """
    B, S, D = x_bsd.shape
    L = stacked['wq'].shape[0]
    F = stacked['w1'].shape[2]
    Bb = B if batch_block is None else batch_block
    assert B % Bb == 0 and D % num_heads == 0
    N_blk = Bb * S

    x2d = x_bsd.reshape(B * S, D).astype(jnp.float32)
    # Additive key mask, computed ONCE and reused by every layer.
    neg = (1.0 - keep_mask.astype(jnp.float32)) * (-1e9)       # (B, 1, S)

    kernel = make_encoder_kernel(Bb, S, D, num_heads, L, fused_heads)

    def wspec(shape):
        return pl.BlockSpec((1,) + shape,
                            lambda bb, l, _s=shape: (l,) + (0,) * len(_s))

    grid = (B // Bb, L)                 # (parallel batch blocks, layers)
    in_specs = [
        pl.BlockSpec((N_blk, D), lambda bb, l: (bb, 0)),       # x (layer-0 seed)
        pl.BlockSpec((Bb, 1, S), lambda bb, l: (bb, 0, 0)),    # additive mask
        wspec((D, D)), wspec((1, D)),   # wq, bq
        wspec((D, D)), wspec((1, D)),   # wk, bk
        wspec((D, D)), wspec((1, D)),   # wv, bv
        wspec((D, D)), wspec((1, D)),   # wo, bo
        wspec((1, D)), wspec((1, D)),   # ln1 gamma, beta
        wspec((D, F)), wspec((1, F)),   # ffn w1, b1
        wspec((F, D)), wspec((1, D)),   # ffn w2, b2
        wspec((1, D)), wspec((1, D)),   # ln2 gamma, beta
    ]
    out_spec = pl.BlockSpec((N_blk, D), lambda bb, l: (bb, 0))

    out2d = pl.pallas_call(
        kernel,
        grid=grid,
        in_specs=in_specs,
        out_specs=out_spec,
        out_shape=jax.ShapeDtypeStruct((B * S, D), jnp.float32),
        compiler_params=pltpu.CompilerParams(
            dimension_semantics=("parallel", "arbitrary"),
            vmem_limit_bytes=32 * 1024 * 1024),
    )(x2d, neg,
      stacked['wq'], stacked['bq'], stacked['wk'], stacked['bk'],
      stacked['wv'], stacked['bv'], stacked['wo'], stacked['bo'],
      stacked['g1'], stacked['be1'], stacked['w1'], stacked['bf1'],
      stacked['w2'], stacked['bf2'], stacked['g2'], stacked['be2'])
    return out2d.reshape(B, S, D)


# ------------------------------ glue (plain JAX) ------------------------------

def positional_encoding(max_len, d_model):
    pos = jnp.arange(max_len, dtype=jnp.float32)[:, None]
    i = jnp.arange(0, d_model, 2, dtype=jnp.float32)[None, :]
    angle = pos / jnp.power(10000.0, i / d_model)
    pe = jnp.zeros((max_len, d_model), jnp.float32)
    pe = pe.at[:, 0::2].set(jnp.sin(angle))
    pe = pe.at[:, 1::2].set(jnp.cos(angle))
    return pe


def init_layer_params(key, d_model, d_ff):
    ks = jax.random.split(key, 12)
    n = lambda k, shape, s=0.05: (jax.random.normal(k, shape) * s).astype(jnp.float32)
    D, F = d_model, d_ff
    return dict(
        wq=n(ks[0], (D, D)), bq=n(ks[1], (1, D)),
        wk=n(ks[2], (D, D)), bk=n(ks[3], (1, D)),
        wv=n(ks[4], (D, D)), bv=n(ks[5], (1, D)),
        wo=n(ks[6], (D, D)), bo=n(ks[7], (1, D)),
        g1=jnp.ones((1, D), jnp.float32), be1=jnp.zeros((1, D), jnp.float32),
        w1=n(ks[8], (D, F)), bf1=n(ks[9], (1, F)),
        w2=n(ks[10], (F, D)), bf2=n(ks[11], (1, D)),
        g2=jnp.ones((1, D), jnp.float32), be2=jnp.zeros((1, D), jnp.float32),
    )


def stack_layer_params(layer_params):
    # Matmul weights go to bf16 (MXU-native input dtype, halves weight DMA);
    # biases and LN params stay f32 (VPU math stays f32).
    mm = ('wq', 'wk', 'wv', 'wo', 'w1', 'w2')
    other = ('bq', 'bk', 'bv', 'bo', 'g1', 'be1', 'bf1', 'bf2', 'g2', 'be2')
    out = {}
    for name in mm:
        out[name] = jnp.stack([p[name] for p in layer_params]).astype(jnp.bfloat16)
    for name in other:
        out[name] = jnp.stack([p[name] for p in layer_params]).astype(jnp.float32)
    return out


def ref_encoder(x, keep_mask, layer_params, H):
    """Pure-JAX reference with the same bf16-operand / f32-accumulate matmuls."""
    bf16, f32 = jnp.bfloat16, jnp.float32

    def bdot(a, b):
        return jnp.dot(a.astype(bf16), b.astype(bf16), preferred_element_type=f32)

    def ln(v, g, b):
        mu = v.mean(-1, keepdims=True)
        var = ((v - mu) ** 2).mean(-1, keepdims=True)
        return (v - mu) / jnp.sqrt(var + 1e-5) * g + b

    B, S, D = x.shape
    Dh = D // H
    N = B * S
    neg = (1.0 - keep_mask) * (-1e9)                       # (B,1,S)
    for p in layer_params:
        x2 = x.reshape(N, D)
        q = bdot(x2, p['wq']) + p['bq']
        k = bdot(x2, p['wk']) + p['bk']
        v = bdot(x2, p['wv']) + p['bv']
        q4 = q.reshape(B, S, H, Dh).astype(bf16)
        k4 = k.reshape(B, S, H, Dh).astype(bf16)
        v4 = v.reshape(B, S, H, Dh).astype(bf16)
        sc = jnp.einsum('bqhd,bkhd->bhqk', q4, k4,
                        preferred_element_type=f32) / math.sqrt(Dh)
        sc = sc + neg[:, None, :, :]
        pw = jax.nn.softmax(sc, axis=-1)
        ctx = jnp.einsum('bhqk,bkhd->bqhd', pw.astype(bf16), v4,
                         preferred_element_type=f32)
        attn = bdot(ctx.reshape(N, D), p['wo']) + p['bo']
        x1 = ln(x2 + attn, p['g1'], p['be1'])
        ff = bdot(jnp.maximum(bdot(x1, p['w1']) + p['bf1'], 0.0), p['w2']) + p['bf2']
        x = ln(x1 + ff, p['g2'], p['be2']).reshape(B, S, D)
    return x


# ----------------------------------- main -------------------------------------

if __name__ == "__main__":
    B, S = 2, 8
    vocab_size, d_model, num_layers, num_heads, d_ff, max_seq = 50, 32, 2, 4, 64, 16

    key = jax.random.PRNGKey(0)
    k_emb, k_ids, k_layers = jax.random.split(key, 3)

    # embedding table + token ids + keep-mask (1.0 = attend, 0.0 = masked)
    emb_table = (jax.random.normal(k_emb, (vocab_size, d_model)) * 0.05).astype(jnp.float32)
    token_ids = jax.random.randint(k_ids, (B, S), 0, vocab_size)
    keep_mask = jnp.ones((B, 1, S), jnp.float32)
    keep_mask = keep_mask.at[1, :, 6:].set(0.0)            # mask last 2 keys of batch 1

    # InputEmbeddings: emb(x) * sqrt(d_model);  PositionalEncoding: + PE[:S]
    # (gather + PE done in plain JAX; one-time, tiny, not a good Pallas fit)
    pe = positional_encoding(max_seq, d_model)
    x = (emb_table[token_ids] * jnp.sqrt(jnp.float32(d_model)) + pe[:S][None]).astype(jnp.float32)

    layer_params = [init_layer_params(jax.random.fold_in(k_layers, l), d_model, d_ff)
                    for l in range(num_layers)]
    stacked = stack_layer_params(layer_params)
    ref = ref_encoder(x, keep_mask, layer_params, num_heads)

    def run(fused):
        return jax.block_until_ready(
            transformer_encoder_pallas(x, keep_mask, stacked,
                                       num_heads=num_heads, fused_heads=fused))

    try:
        out = run(True)
        err = float(jnp.max(jnp.abs(out - ref)))
        if not (err < 2e-2):
            raise ValueError(f"fused-head path mismatch: {err}")
    except Exception:
        # TODO(synk): multi-batch-dim einsum ('bqhd,bkhd->bhqk') not supported /
        # miscompiled by this Mosaic build -> use the guarded per-head fallback.
        out = run(False)
        err = float(jnp.max(jnp.abs(out - ref)))

    assert out.shape == (B, S, d_model)
    assert err < 2e-2, f"max abs diff {err}"
    print("KERNEL_OK")
</pallas_src>

<mosaic_0001>
module attributes {stable_mosaic.version = 11 : i64} {
  func.func @kernel(%arg0: i32, %arg1: i32, %arg2: memref<16x32xf32, #tpu.memory_space<vmem>>, %arg3: memref<2x1x8xf32, #tpu.memory_space<vmem>>, %arg4: memref<1x32x32xbf16, #tpu.memory_space<vmem>>, %arg5: memref<1x1x32xf32, #tpu.memory_space<vmem>>, %arg6: memref<1x32x32xbf16, #tpu.memory_space<vmem>>, %arg7: memref<1x1x32xf32, #tpu.memory_space<vmem>>, %arg8: memref<1x32x32xbf16, #tpu.memory_space<vmem>>, %arg9: memref<1x1x32xf32, #tpu.memory_space<vmem>>, %arg10: memref<1x32x32xbf16, #tpu.memory_space<vmem>>, %arg11: memref<1x1x32xf32, #tpu.memory_space<vmem>>, %arg12: memref<1x1x32xf32, #tpu.memory_space<vmem>>, %arg13: memref<1x1x32xf32, #tpu.memory_space<vmem>>, %arg14: memref<1x32x64xbf16, #tpu.memory_space<vmem>>, %arg15: memref<1x1x64xf32, #tpu.memory_space<vmem>>, %arg16: memref<1x64x32xbf16, #tpu.memory_space<vmem>>, %arg17: memref<1x1x32xf32, #tpu.memory_space<vmem>>, %arg18: memref<1x1x32xf32, #tpu.memory_space<vmem>>, %arg19: memref<1x1x32xf32, #tpu.memory_space<vmem>>, %arg20: memref<16x32xf32, #tpu.memory_space<vmem>>) attributes {dimension_semantics = [#tpu.dimension_semantics<parallel>, #tpu.dimension_semantics<arbitrary>], iteration_bounds = array<i64: 1, 2>, scalar_prefetch = 0 : i64, scratch_operands = 0 : i64, tpu.core_type = #tpu.core_type<tc>, window_params = [{transform_indices = @transform_0, window_bounds = array<i64: 16, 32>}, {transform_indices = @transform_1, window_bounds = array<i64: 2, 1, 8>}, {transform_indices = @transform_2, window_bounds = array<i64: 1, 32, 32>}, {transform_indices = @transform_3, window_bounds = array<i64: 1, 1, 32>}, {transform_indices = @transform_4, window_bounds = array<i64: 1, 32, 32>}, {transform_indices = @transform_5, window_bounds = array<i64: 1, 1, 32>}, {transform_indices = @transform_6, window_bounds = array<i64: 1, 32, 32>}, {transform_indices = @transform_7, window_bounds = array<i64: 1, 1, 32>}, {transform_indices = @transform_8, window_bounds = array<i64: 1, 32, 32>}, {transform_indices = @transform_9, window_bounds = array<i64: 1, 1, 32>}, {transform_indices = @transform_10, window_bounds = array<i64: 1, 1, 32>}, {transform_indices = @transform_11, window_bounds = array<i64: 1, 1, 32>}, {transform_indices = @transform_12, window_bounds = array<i64: 1, 32, 64>}, {transform_indices = @transform_13, window_bounds = array<i64: 1, 1, 64>}, {transform_indices = @transform_14, window_bounds = array<i64: 1, 64, 32>}, {transform_indices = @transform_15, window_bounds = array<i64: 1, 1, 32>}, {transform_indices = @transform_16, window_bounds = array<i64: 1, 1, 32>}, {transform_indices = @transform_17, window_bounds = array<i64: 1, 1, 32>}, {transform_indices = @transform_18, window_bounds = array<i64: 16, 32>}]} {
    %c0_i32 = arith.constant 0 : i32
    %0 = arith.cmpi eq, %arg1, %c0_i32 : i32
    %1 = arith.extui %0 : i1 to i32
    %c0_i32_0 = arith.constant 0 : i32
    %2 = arith.cmpi ne, %1, %c0_i32_0 : i32
    scf.if %2 {
      %c0_95 = arith.constant 0 : index
      %c0_96 = arith.constant 0 : index
      %198 = vector.load %arg2[%c0_95, %c0_96] : memref<16x32xf32, #tpu.memory_space<vmem>>, vector<16x32xf32>
      %c0_97 = arith.constant 0 : index
      %c0_98 = arith.constant 0 : index
      %199 = vector.load %arg20[%c0_97, %c0_98] : memref<16x32xf32, #tpu.memory_space<vmem>>, vector<16x32xf32>
      tpu.vector_store %arg20[%c0_97, %c0_98], %198 {strides = array<i32>} : memref<16x32xf32, #tpu.memory_space<vmem>>, vector<16x32xf32>,
    } else {
    }
    %c0 = arith.constant 0 : index
    %c0_1 = arith.constant 0 : index
    %3 = vector.load %arg20[%c0, %c0_1] : memref<16x32xf32, #tpu.memory_space<vmem>>, vector<16x32xf32>
    %4 = arith.truncf %3 : vector<16x32xf32> to vector<16x32xbf16>
    %c0_2 = arith.constant 0 : index
    %c0_3 = arith.constant 0 : index
    %c0_4 = arith.constant 0 : index
    %5 = vector.load %arg3[%c0_2, %c0_3, %c0_4] : memref<2x1x8xf32, #tpu.memory_space<vmem>>, vector<2x1x8xf32>
    %c0_5 = arith.constant 0 : index
    %c0_6 = arith.constant 0 : index
    %c0_7 = arith.constant 0 : index
    %6 = vector.load %arg4[%c0_5, %c0_6, %c0_7] : memref<1x32x32xbf16, #tpu.memory_space<vmem>>, vector<1x32x32xbf16>
    %7 = vector.shape_cast %6 : vector<1x32x32xbf16> to vector<32x32xbf16>
    %cst = arith.constant dense<0.000000e+00> : vector<16x32xf32>
    %8 = tpu.matmul %4, %7, %cst {dimension_numbers = #tpu.dot_dimension_numbers<[1], [0], [0], [1], [0, 0, 1, 1], [], []>} : vector<16x32xbf16>, vector<32x32xbf16>, vector<16x32xf32> -> vector<16x32xf32>
    %c0_8 = arith.constant 0 : index
    %c0_9 = arith.constant 0 : index
    %c0_10 = arith.constant 0 : index
    %9 = vector.load %arg5[%c0_8, %c0_9, %c0_10] : memref<1x1x32xf32, #tpu.memory_space<vmem>>, vector<1x1x32xf32>
    %10 = vector.shape_cast %9 : vector<1x1x32xf32> to vector<1x32xf32>
    %11 = vector.broadcast %10 : vector<1x32xf32> to vector<16x32xf32>
    %12 = arith.addf %8, %11 : vector<16x32xf32>
    %c0_11 = arith.constant 0 : index
    %c0_12 = arith.constant 0 : index
    %c0_13 = arith.constant 0 : index
    %13 = vector.load %arg6[%c0_11, %c0_12, %c0_13] : memref<1x32x32xbf16, #tpu.memory_space<vmem>>, vector<1x32x32xbf16>
    %14 = vector.shape_cast %13 : vector<1x32x32xbf16> to vector<32x32xbf16>
    %cst_14 = arith.constant dense<0.000000e+00> : vector<16x32xf32>
    %15 = tpu.matmul %4, %14, %cst_14 {dimension_numbers = #tpu.dot_dimension_numbers<[1], [0], [0], [1], [0, 0, 1, 1], [], []>} : vector<16x32xbf16>, vector<32x32xbf16>, vector<16x32xf32> -> vector<16x32xf32>
    %c0_15 = arith.constant 0 : index
    %c0_16 = arith.constant 0 : index
    %c0_17 = arith.constant 0 : index
    %16 = vector.load %arg7[%c0_15, %c0_16, %c0_17] : memref<1x1x32xf32, #tpu.memory_space<vmem>>, vector<1x1x32xf32>
    %17 = vector.shape_cast %16 : vector<1x1x32xf32> to vector<1x32xf32>
    %18 = vector.broadcast %17 : vector<1x32xf32> to vector<16x32xf32>
    %19 = arith.addf %15, %18 : vector<16x32xf32>
    %c0_18 = arith.constant 0 : index
    %c0_19 = arith.constant 0 : index
    %c0_20 = arith.constant 0 : index
    %20 = vector.load %arg8[%c0_18, %c0_19, %c0_20] : memref<1x32x32xbf16, #tpu.memory_space<vmem>>, vector<1x32x32xbf16>
    %21 = vector.shape_cast %20 : vector<1x32x32xbf16> to vector<32x32xbf16>
    %cst_21 = arith.constant dense<0.000000e+00> : vector<16x32xf32>
    %22 = tpu.matmul %4, %21, %cst_21 {dimension_numbers = #tpu.dot_dimension_numbers<[1], [0], [0], [1], [0, 0, 1, 1], [], []>} : vector<16x32xbf16>, vector<32x32xbf16>, vector<16x32xf32> -> vector<16x32xf32>
    %c0_22 = arith.constant 0 : index
    %c0_23 = arith.constant 0 : index
    %c0_24 = arith.constant 0 : index
    %23 = vector.load %arg9[%c0_22, %c0_23, %c0_24] : memref<1x1x32xf32, #tpu.memory_space<vmem>>, vector<1x1x32xf32>
    %24 = vector.shape_cast %23 : vector<1x1x32xf32> to vector<1x32xf32>
    %25 = vector.broadcast %24 : vector<1x32xf32> to vector<16x32xf32>
    %26 = arith.addf %22, %25 : vector<16x32xf32>
    %27 = vector.shape_cast %12 : vector<16x32xf32> to vector<2x8x32xf32>
    %28 = vector.shape_cast %19 : vector<16x32xf32> to vector<2x8x32xf32>
    %29 = vector.shape_cast %26 : vector<16x32xf32> to vector<2x8x32xf32>
    %c0_25 = arith.constant 0 : index
    %c0_26 = arith.constant 0 : index
    %c0_27 = arith.constant 0 : index
    %30 = vector.load %arg10[%c0_25, %c0_26, %c0_27] : memref<1x32x32xbf16, #tpu.memory_space<vmem>>, vector<1x32x32xbf16>
    %31 = vector.shape_cast %30 : vector<1x32x32xbf16> to vector<32x32xbf16>
    %32 = arith.extf %31 : vector<32x32xbf16> to vector<32x32xf32>
    %33 = vector.shape_cast %5 : vector<2x1x8xf32> to vector<2x1x8xf32>
    %34 = vector.broadcast %33 : vector<2x1x8xf32> to vector<2x8x8xf32>
    %cst_28 = arith.constant 0.000000e+00 : f32
    %35 = vector.broadcast %cst_28 : f32 to vector<2x8x32xf32>
    %36 = vector.extract_strided_slice %27 {offsets = [0, 0, 0], sizes = [2, 8, 8], strides = [1, 1, 1]} : vector<2x8x32xf32> to vector<2x8x8xf32>
    %37 = vector.extract_strided_slice %28 {offsets = [0, 0, 0], sizes = [2, 8, 8], strides = [1, 1, 1]} : vector<2x8x32xf32> to vector<2x8x8xf32>
    "tpu.trace_start"() <{level = 10 : i32, message = "bqd,bkd->bqk"}> : () -> ()
    %cst_29 = arith.constant dense<0.000000e+00> : vector<2x8x8xf32>
    %38 = tpu.matmul %36, %37, %cst_29 {dimension_numbers = #tpu.dot_dimension_numbers<[2], [2], [1], [1], [0, 0, 0, 1, 1, 1], [0], [0]>} : vector<2x8x8xf32>, vector<2x8x8xf32>, vector<2x8x8xf32> -> vector<2x8x8xf32>
    "tpu.trace_stop"() : () -> ()
    %cst_30 = arith.constant 0.353553385 : f32
    %39 = vector.broadcast %cst_30 : f32 to vector<2x8x8xf32>
    %40 = arith.mulf %38, %39 : vector<2x8x8xf32>
    %41 = arith.addf %40, %34 : vector<2x8x8xf32>
    %cst_31 = arith.constant dense<0xFF800000> : vector<2x8xf32>
    %42 = vector.multi_reduction <maximumf>, %41, %cst_31 [2] : vector<2x8x8xf32> to vector<2x8xf32>
    %43 = vector.shape_cast %42 : vector<2x8xf32> to vector<2x8x1xf32>
    %44 = vector.broadcast %43 : vector<2x8x1xf32> to vector<2x8x8xf32>
    %45 = arith.subf %41, %44 : vector<2x8x8xf32>
    %46 = math.exp %45 : vector<2x8x8xf32>
    %cst_32 = arith.constant dense<0.000000e+00> : vector<2x8xf32>
    %47 = vector.multi_reduction <add>, %46, %cst_32 [2] : vector<2x8x8xf32> to vector<2x8xf32>
    %48 = vector.shape_cast %47 : vector<2x8xf32> to vector<2x8x1xf32>
    %49 = tpu.reciprocal %48 {approx = true} : vector<2x8x1xf32> -> vector<2x8x1xf32>
    %50 = vector.broadcast %49 : vector<2x8x1xf32> to vector<2x8x8xf32>
    %51 = arith.mulf %46, %50 : vector<2x8x8xf32>
    %52 = vector.extract_strided_slice %29 {offsets = [0, 0, 0], sizes = [2, 8, 8], strides = [1, 1, 1]} : vector<2x8x32xf32> to vector<2x8x8xf32>
    "tpu.trace_start"() <{level = 10 : i32, message = "bqk,bkd->bqd"}> : () -> ()
    %cst_33 = arith.constant dense<0.000000e+00> : vector<2x8x8xf32>
    %53 = tpu.matmul %51, %52, %cst_33 {dimension_numbers = #tpu.dot_dimension_numbers<[2], [1], [1], [2], [0, 0, 0, 1, 1, 2], [0], [0]>} : vector<2x8x8xf32>, vector<2x8x8xf32>, vector<2x8x8xf32> -> vector<2x8x8xf32>
    "tpu.trace_stop"() : () -> ()
    %54 = vector.extract_strided_slice %32 {offsets = [0, 0], sizes = [8, 32], strides = [1, 1]} : vector<32x32xf32> to vector<8x32xf32>
    "tpu.trace_start"() <{level = 10 : i32, message = "bsd,de->bse"}> : () -> ()
    %cst_34 = arith.constant dense<0.000000e+00> : vector<2x8x32xf32>
    %55 = tpu.matmul %53, %54, %cst_34 {dimension_numbers = #tpu.dot_dimension_numbers<[2], [0], [0, 1], [1], [0, 0, 0, 1, 1, 1], [], []>} : vector<2x8x8xf32>, vector<8x32xf32>, vector<2x8x32xf32> -> vector<2x8x32xf32>
    "tpu.trace_stop"() : () -> ()
    %56 = arith.addf %35, %55 : vector<2x8x32xf32>
    %57 = vector.extract_strided_slice %27 {offsets = [0, 0, 8], sizes = [2, 8, 8], strides = [1, 1, 1]} : vector<2x8x32xf32> to vector<2x8x8xf32>
    %58 = vector.extract_strided_slice %28 {offsets = [0, 0, 8], sizes = [2, 8, 8], strides = [1, 1, 1]} : vector<2x8x32xf32> to vector<2x8x8xf32>
    "tpu.trace_start"() <{level = 10 : i32, message = "bqd,bkd->bqk"}> : () -> ()
    %cst_35 = arith.constant dense<0.000000e+00> : vector<2x8x8xf32>
    %59 = tpu.matmul %57, %58, %cst_35 {dimension_numbers = #tpu.dot_dimension_numbers<[2], [2], [1], [1], [0, 0, 0, 1, 1, 1], [0], [0]>} : vector<2x8x8xf32>, vector<2x8x8xf32>, vector<2x8x8xf32> -> vector<2x8x8xf32>
    "tpu.trace_stop"() : () -> ()
    %cst_36 = arith.constant 0.353553385 : f32
    %60 = vector.broadcast %cst_36 : f32 to vector<2x8x8xf32>
    %61 = arith.mulf %59, %60 : vector<2x8x8xf32>
    %62 = arith.addf %61, %34 : vector<2x8x8xf32>
    %cst_37 = arith.constant dense<0xFF800000> : vector<2x8xf32>
    %63 = vector.multi_reduction <maximumf>, %62, %cst_37 [2] : vector<2x8x8xf32> to vector<2x8xf32>
    %64 = vector.shape_cast %63 : vector<2x8xf32> to vector<2x8x1xf32>
    %65 = vector.broadcast %64 : vector<2x8x1xf32> to vector<2x8x8xf32>
    %66 = arith.subf %62, %65 : vector<2x8x8xf32>
    %67 = math.exp %66 : vector<2x8x8xf32>
    %cst_38 = arith.constant dense<0.000000e+00> : vector<2x8xf32>
    %68 = vector.multi_reduction <add>, %67, %cst_38 [2] : vector<2x8x8xf32> to vector<2x8xf32>
    %69 = vector.shape_cast %68 : vector<2x8xf32> to vector<2x8x1xf32>
    %70 = tpu.reciprocal %69 {approx = true} : vector<2x8x1xf32> -> vector<2x8x1xf32>
    %71 = vector.broadcast %70 : vector<2x8x1xf32> to vector<2x8x8xf32>
    %72 = arith.mulf %67, %71 : vector<2x8x8xf32>
    %73 = vector.extract_strided_slice %29 {offsets = [0, 0, 8], sizes = [2, 8, 8], strides = [1, 1, 1]} : vector<2x8x32xf32> to vector<2x8x8xf32>
    "tpu.trace_start"() <{level = 10 : i32, message = "bqk,bkd->bqd"}> : () -> ()
    %cst_39 = arith.constant dense<0.000000e+00> : vector<2x8x8xf32>
    %74 = tpu.matmul %72, %73, %cst_39 {dimension_numbers = #tpu.dot_dimension_numbers<[2], [1], [1], [2], [0, 0, 0, 1, 1, 2], [0], [0]>} : vector<2x8x8xf32>, vector<2x8x8xf32>, vector<2x8x8xf32> -> vector<2x8x8xf32>
    "tpu.trace_stop"() : () -> ()
    %75 = vector.extract_strided_slice %32 {offsets = [8, 0], sizes = [8, 32], strides = [1, 1]} : vector<32x32xf32> to vector<8x32xf32>
    "tpu.trace_start"() <{level = 10 : i32, message = "bsd,de->bse"}> : () -> ()
    %cst_40 = arith.constant dense<0.000000e+00> : vector<2x8x32xf32>
    %76 = tpu.matmul %74, %75, %cst_40 {dimension_numbers = #tpu.dot_dimension_numbers<[2], [0], [0, 1], [1], [0, 0, 0, 1, 1, 1], [], []>} : vector<2x8x8xf32>, vector<8x32xf32>, vector<2x8x32xf32> -> vector<2x8x32xf32>
    "tpu.trace_stop"() : () -> ()
    %77 = arith.addf %56, %76 : vector<2x8x32xf32>
    %78 = vector.extract_strided_slice %27 {offsets = [0, 0, 16], sizes = [2, 8, 8], strides = [1, 1, 1]} : vector<2x8x32xf32> to vector<2x8x8xf32>
    %79 = vector.extract_strided_slice %28 {offsets = [0, 0, 16], sizes = [2, 8, 8], strides = [1, 1, 1]} : vector<2x8x32xf32> to vector<2x8x8xf32>
    "tpu.trace_start"() <{level = 10 : i32, message = "bqd,bkd->bqk"}> : () -> ()
    %cst_41 = arith.constant dense<0.000000e+00> : vector<2x8x8xf32>
    %80 = tpu.matmul %78, %79, %cst_41 {dimension_numbers = #tpu.dot_dimension_numbers<[2], [2], [1], [1], [0, 0, 0, 1, 1, 1], [0], [0]>} : vector<2x8x8xf32>, vector<2x8x8xf32>, vector<2x8x8xf32> -> vector<2x8x8xf32>
    "tpu.trace_stop"() : () -> ()
    %cst_42 = arith.constant 0.353553385 : f32
    %81 = vector.broadcast %cst_42 : f32 to vector<2x8x8xf32>
    %82 = arith.mulf %80, %81 : vector<2x8x8xf32>
    %83 = arith.addf %82, %34 : vector<2x8x8xf32>
    %cst_43 = arith.constant dense<0xFF800000> : vector<2x8xf32>
    %84 = vector.multi_reduction <maximumf>, %83, %cst_43 [2] : vector<2x8x8xf32> to vector<2x8xf32>
    %85 = vector.shape_cast %84 : vector<2x8xf32> to vector<2x8x1xf32>
    %86 = vector.broadcast %85 : vector<2x8x1xf32> to vector<2x8x8xf32>
    %87 = arith.subf %83, %86 : vector<2x8x8xf32>
    %88 = math.exp %87 : vector<2x8x8xf32>
    %cst_44 = arith.constant dense<0.000000e+00> : vector<2x8xf32>
    %89 = vector.multi_reduction <add>, %88, %cst_44 [2] : vector<2x8x8xf32> to vector<2x8xf32>
    %90 = vector.shape_cast %89 : vector<2x8xf32> to vector<2x8x1xf32>
    %91 = tpu.reciprocal %90 {approx = true} : vector<2x8x1xf32> -> vector<2x8x1xf32>
    %92 = vector.broadcast %91 : vector<2x8x1xf32> to vector<2x8x8xf32>
    %93 = arith.mulf %88, %92 : vector<2x8x8xf32>
    %94 = vector.extract_strided_slice %29 {offsets = [0, 0, 16], sizes = [2, 8, 8], strides = [1, 1, 1]} : vector<2x8x32xf32> to vector<2x8x8xf32>
    "tpu.trace_start"() <{level = 10 : i32, message = "bqk,bkd->bqd"}> : () -> ()
    %cst_45 = arith.constant dense<0.000000e+00> : vector<2x8x8xf32>
    %95 = tpu.matmul %93, %94, %cst_45 {dimension_numbers = #tpu.dot_dimension_numbers<[2], [1], [1], [2], [0, 0, 0, 1, 1, 2], [0], [0]>} : vector<2x8x8xf32>, vector<2x8x8xf32>, vector<2x8x8xf32> -> vector<2x8x8xf32>
    "tpu.trace_stop"() : () -> ()
    %96 = vector.extract_strided_slice %32 {offsets = [16, 0], sizes = [8, 32], strides = [1, 1]} : vector<32x32xf32> to vector<8x32xf32>
    "tpu.trace_start"() <{level = 10 : i32, message = "bsd,de->bse"}> : () -> ()
    %cst_46 = arith.constant dense<0.000000e+00> : vector<2x8x32xf32>
    %97 = tpu.matmul %95, %96, %cst_46 {dimension_numbers = #tpu.dot_dimension_numbers<[2], [0], [0, 1], [1], [0, 0, 0, 1, 1, 1], [], []>} : vector<2x8x8xf32>, vector<8x32xf32>, vector<2x8x32xf32> -> vector<2x8x32xf32>
    "tpu.trace_stop"() : () -> ()
    %98 = arith.addf %77, %97 : vector<2x8x32xf32>
    %99 = vector.extract_strided_slice %27 {offsets = [0, 0, 24], sizes = [2, 8, 8], strides = [1, 1, 1]} : vector<2x8x32xf32> to vector<2x8x8xf32>
    %100 = vector.extract_strided_slice %28 {offsets = [0, 0, 24], sizes = [2, 8, 8], strides = [1, 1, 1]} : vector<2x8x32xf32> to vector<2x8x8xf32>
    "tpu.trace_start"() <{level = 10 : i32, message = "bqd,bkd->bqk"}> : () -> ()
    %cst_47 = arith.constant dense<0.000000e+00> : vector<2x8x8xf32>
    %101 = tpu.matmul %99, %100, %cst_47 {dimension_numbers = #tpu.dot_dimension_numbers<[2], [2], [1], [1], [0, 0, 0, 1, 1, 1], [0], [0]>} : vector<2x8x8xf32>, vector<2x8x8xf32>, vector<2x8x8xf32> -> vector<2x8x8xf32>
    "tpu.trace_stop"() : () -> ()
    %cst_48 = arith.constant 0.353553385 : f32
    %102 = vector.broadcast %cst_48 : f32 to vector<2x8x8xf32>
    %103 = arith.mulf %101, %102 : vector<2x8x8xf32>
    %104 = arith.addf %103, %34 : vector<2x8x8xf32>
    %cst_49 = arith.constant dense<0xFF800000> : vector<2x8xf32>
    %105 = vector.multi_reduction <maximumf>, %104, %cst_49 [2] : vector<2x8x8xf32> to vector<2x8xf32>
    %106 = vector.shape_cast %105 : vector<2x8xf32> to vector<2x8x1xf32>
    %107 = vector.broadcast %106 : vector<2x8x1xf32> to vector<2x8x8xf32>
    %108 = arith.subf %104, %107 : vector<2x8x8xf32>
    %109 = math.exp %108 : vector<2x8x8xf32>
    %cst_50 = arith.constant dense<0.000000e+00> : vector<2x8xf32>
    %110 = vector.multi_reduction <add>, %109, %cst_50 [2] : vector<2x8x8xf32> to vector<2x8xf32>
    %111 = vector.shape_cast %110 : vector<2x8xf32> to vector<2x8x1xf32>
    %112 = tpu.reciprocal %111 {approx = true} : vector<2x8x1xf32> -> vector<2x8x1xf32>
    %113 = vector.broadcast %112 : vector<2x8x1xf32> to vector<2x8x8xf32>
    %114 = arith.mulf %109, %113 : vector<2x8x8xf32>
    %115 = vector.extract_strided_slice %29 {offsets = [0, 0, 24], sizes = [2, 8, 8], strides = [1, 1, 1]} : vector<2x8x32xf32> to vector<2x8x8xf32>
    "tpu.trace_start"() <{level = 10 : i32, message = "bqk,bkd->bqd"}> : () -> ()
    %cst_51 = arith.constant dense<0.000000e+00> : vector<2x8x8xf32>
    %116 = tpu.matmul %114, %115, %cst_51 {dimension_numbers = #tpu.dot_dimension_numbers<[2], [1], [1], [2], [0, 0, 0, 1, 1, 2], [0], [0]>} : vector<2x8x8xf32>, vector<2x8x8xf32>, vector<2x8x8xf32> -> vector<2x8x8xf32>
    "tpu.trace_stop"() : () -> ()
    %117 = vector.extract_strided_slice %32 {offsets = [24, 0], sizes = [8, 32], strides = [1, 1]} : vector<32x32xf32> to vector<8x32xf32>
    "tpu.trace_start"() <{level = 10 : i32, message = "bsd,de->bse"}> : () -> ()
    %cst_52 = arith.constant dense<0.000000e+00> : vector<2x8x32xf32>
    %118 = tpu.matmul %116, %117, %cst_52 {dimension_numbers = #tpu.dot_dimension_numbers<[2], [0], [0, 1], [1], [0, 0, 0, 1, 1, 1], [], []>} : vector<2x8x8xf32>, vector<8x32xf32>, vector<2x8x32xf32> -> vector<2x8x32xf32>
    "tpu.trace_stop"() : () -> ()
    %119 = arith.addf %98, %118 : vector<2x8x32xf32>
    %120 = vector.shape_cast %119 : vector<2x8x32xf32> to vector<16x32xf32>
    %c0_53 = arith.constant 0 : index
    %c0_54 = arith.constant 0 : index
    %c0_55 = arith.constant 0 : index
    %121 = vector.load %arg11[%c0_53, %c0_54, %c0_55] : memref<1x1x32xf32, #tpu.memory_space<vmem>>, vector<1x1x32xf32>
    %122 = vector.shape_cast %121 : vector<1x1x32xf32> to vector<1x32xf32>
    %123 = vector.broadcast %122 : vector<1x32xf32> to vector<16x32xf32>
    %124 = arith.addf %120, %123 : vector<16x32xf32>
    %125 = arith.addf %3, %124 : vector<16x32xf32>
    %cst_56 = arith.constant dense<0.000000e+00> : vector<16xf32>
    %126 = vector.multi_reduction <add>, %125, %cst_56 [1] : vector<16x32xf32> to vector<16xf32>
    %127 = vector.shape_cast %126 : vector<16xf32> to vector<16x1xf32>
    %cst_57 = arith.constant 3.200000e+01 : f32
    %128 = vector.broadcast %cst_57 : f32 to vector<16x1xf32>
    %129 = arith.divf %127, %128 : vector<16x1xf32>
    %130 = vector.broadcast %129 : vector<16x1xf32> to vector<16x32xf32>
    %131 = arith.subf %125, %130 : vector<16x32xf32>
    %132 = arith.mulf %131, %131 : vector<16x32xf32>
    %cst_58 = arith.constant dense<0.000000e+00> : vector<16xf32>
    %133 = vector.multi_reduction <add>, %132, %cst_58 [1] : vector<16x32xf32> to vector<16xf32>
    %134 = vector.shape_cast %133 : vector<16xf32> to vector<16x1xf32>
    %cst_59 = arith.constant 3.200000e+01 : f32
    %135 = vector.broadcast %cst_59 : f32 to vector<16x1xf32>
    %136 = arith.divf %134, %135 : vector<16x1xf32>
    %137 = vector.broadcast %129 : vector<16x1xf32> to vector<16x32xf32>
    %138 = arith.subf %125, %137 : vector<16x32xf32>
    %cst_60 = arith.constant 9.99999974E-6 : f32
    %139 = vector.broadcast %cst_60 : f32 to vector<16x1xf32>
    %140 = arith.addf %136, %139 : vector<16x1xf32>
    %141 = math.rsqrt %140 : vector<16x1xf32>
    %142 = vector.broadcast %141 : vector<16x1xf32> to vector<16x32xf32>
    %143 = arith.mulf %138, %142 : vector<16x32xf32>
    %c0_61 = arith.constant 0 : index
    %c0_62 = arith.constant 0 : index
    %c0_63 = arith.constant 0 : index
    %144 = vector.load %arg12[%c0_61, %c0_62, %c0_63] : memref<1x1x32xf32, #tpu.memory_space<vmem>>, vector<1x1x32xf32>
    %145 = vector.shape_cast %144 : vector<1x1x32xf32> to vector<1x32xf32>
    %146 = vector.broadcast %145 : vector<1x32xf32> to vector<16x32xf32>
    %147 = arith.mulf %143, %146 : vector<16x32xf32>
    %c0_64 = arith.constant 0 : index
    %c0_65 = arith.constant 0 : index
    %c0_66 = arith.constant 0 : index
    %148 = vector.load %arg13[%c0_64, %c0_65, %c0_66] : memref<1x1x32xf32, #tpu.memory_space<vmem>>, vector<1x1x32xf32>
    %149 = vector.shape_cast %148 : vector<1x1x32xf32> to vector<1x32xf32>
    %150 = vector.broadcast %149 : vector<1x32xf32> to vector<16x32xf32>
    %151 = arith.addf %147, %150 : vector<16x32xf32>
    %152 = arith.truncf %151 : vector<16x32xf32> to vector<16x32xbf16>
    %c0_67 = arith.constant 0 : index
    %c0_68 = arith.constant 0 : index
    %c0_69 = arith.constant 0 : index
    %153 = vector.load %arg14[%c0_67, %c0_68, %c0_69] : memref<1x32x64xbf16, #tpu.memory_space<vmem>>, vector<1x32x64xbf16>
    %154 = vector.shape_cast %153 : vector<1x32x64xbf16> to vector<32x64xbf16>
    %cst_70 = arith.constant dense<0.000000e+00> : vector<16x64xf32>
    %155 = tpu.matmul %152, %154, %cst_70 {dimension_numbers = #tpu.dot_dimension_numbers<[1], [0], [0], [1], [0, 0, 1, 1], [], []>} : vector<16x32xbf16>, vector<32x64xbf16>, vector<16x64xf32> -> vector<16x64xf32>
    %c0_71 = arith.constant 0 : index
    %c0_72 = arith.constant 0 : index
    %c0_73 = arith.constant 0 : index
    %156 = vector.load %arg15[%c0_71, %c0_72, %c0_73] : memref<1x1x64xf32, #tpu.memory_space<vmem>>, vector<1x1x64xf32>
    %157 = vector.shape_cast %156 : vector<1x1x64xf32> to vector<1x64xf32>
    %158 = vector.broadcast %157 : vector<1x64xf32> to vector<16x64xf32>
    %159 = arith.addf %155, %158 : vector<16x64xf32>
    %cst_74 = arith.constant 0.000000e+00 : f32
    %160 = vector.broadcast %cst_74 : f32 to vector<16x64xf32>
    %161 = arith.maximumf %159, %160 : vector<16x64xf32>
    %162 = arith.truncf %161 : vector<16x64xf32> to vector<16x64xbf16>
    %c0_75 = arith.constant 0 : index
    %c0_76 = arith.constant 0 : index
    %c0_77 = arith.constant 0 : index
    %163 = vector.load %arg16[%c0_75, %c0_76, %c0_77] : memref<1x64x32xbf16, #tpu.memory_space<vmem>>, vector<1x64x32xbf16>
    %164 = vector.shape_cast %163 : vector<1x64x32xbf16> to vector<64x32xbf16>
    %cst_78 = arith.constant dense<0.000000e+00> : vector<16x32xf32>
    %165 = tpu.matmul %162, %164, %cst_78 {dimension_numbers = #tpu.dot_dimension_numbers<[1], [0], [0], [1], [0, 0, 1, 1], [], []>} : vector<16x64xbf16>, vector<64x32xbf16>, vector<16x32xf32> -> vector<16x32xf32>
    %c0_79 = arith.constant 0 : index
    %c0_80 = arith.constant 0 : index
    %c0_81 = arith.constant 0 : index
    %166 = vector.load %arg17[%c0_79, %c0_80, %c0_81] : memref<1x1x32xf32, #tpu.memory_space<vmem>>, vector<1x1x32xf32>
    %167 = vector.shape_cast %166 : vector<1x1x32xf32> to vector<1x32xf32>
    %168 = vector.broadcast %167 : vector<1x32xf32> to vector<16x32xf32>
    %169 = arith.addf %165, %168 : vector<16x32xf32>
    %170 = arith.addf %151, %169 : vector<16x32xf32>
    %cst_82 = arith.constant dense<0.000000e+00> : vector<16xf32>
    %171 = vector.multi_reduction <add>, %170, %cst_82 [1] : vector<16x32xf32> to vector<16xf32>
    %172 = vector.shape_cast %171 : vector<16xf32> to vector<16x1xf32>
    %cst_83 = arith.constant 3.200000e+01 : f32
    %173 = vector.broadcast %cst_83 : f32 to vector<16x1xf32>
    %174 = arith.divf %172, %173 : vector<16x1xf32>
    %175 = vector.broadcast %174 : vector<16x1xf32> to vector<16x32xf32>
    %176 = arith.subf %170, %175 : vector<16x32xf32>
    %177 = arith.mulf %176, %176 : vector<16x32xf32>
    %cst_84 = arith.constant dense<0.000000e+00> : vector<16xf32>
    %178 = vector.multi_reduction <add>, %177, %cst_84 [1] : vector<16x32xf32> to vector<16xf32>
    %179 = vector.shape_cast %178 : vector<16xf32> to vector<16x1xf32>
    %cst_85 = arith.constant 3.200000e+01 : f32
    %180 = vector.broadcast %cst_85 : f32 to vector<16x1xf32>
    %181 = arith.divf %179, %180 : vector<16x1xf32>
    %182 = vector.broadcast %174 : vector<16x1xf32> to vector<16x32xf32>
    %183 = arith.subf %170, %182 : vector<16x32xf32>
    %cst_86 = arith.constant 9.99999974E-6 : f32
    %184 = vector.broadcast %cst_86 : f32 to vector<16x1xf32>
    %185 = arith.addf %181, %184 : vector<16x1xf32>
    %186 = math.rsqrt %185 : vector<16x1xf32>
    %187 = vector.broadcast %186 : vector<16x1xf32> to vector<16x32xf32>
    %188 = arith.mulf %183, %187 : vector<16x32xf32>
    %c0_87 = arith.constant 0 : index
    %c0_88 = arith.constant 0 : index
    %c0_89 = arith.constant 0 : index
    %189 = vector.load %arg18[%c0_87, %c0_88, %c0_89] : memref<1x1x32xf32, #tpu.memory_space<vmem>>, vector<1x1x32xf32>
    %190 = vector.shape_cast %189 : vector<1x1x32xf32> to vector<1x32xf32>
    %191 = vector.broadcast %190 : vector<1x32xf32> to vector<16x32xf32>
    %192 = arith.mulf %188, %191 : vector<16x32xf32>
    %c0_90 = arith.constant 0 : index
    %c0_91 = arith.constant 0 : index
    %c0_92 = arith.constant 0 : index
    %193 = vector.load %arg19[%c0_90, %c0_91, %c0_92] : memref<1x1x32xf32, #tpu.memory_space<vmem>>, vector<1x1x32xf32>
    %194 = vector.shape_cast %193 : vector<1x1x32xf32> to vector<1x32xf32>
    %195 = vector.broadcast %194 : vector<1x32xf32> to vector<16x32xf32>
    %196 = arith.addf %192, %195 : vector<16x32xf32>
    %c0_93 = arith.constant 0 : index
    %c0_94 = arith.constant 0 : index
    %197 = vector.load %arg20[%c0_93, %c0_94] : memref<16x32xf32, #tpu.memory_space<vmem>>, vector<16x32xf32>
    tpu.vector_store %arg20[%c0_93, %c0_94], %196 {strides = array<i32>} : memref<16x32xf32, #tpu.memory_space<vmem>>, vector<16x32xf32>,
    return
  }
  func.func @transform_0(%arg0: i32, %arg1: i32) -> (i32, i32) {
    %c0_i32 = arith.constant 0 : i32
    %c0_i32_0 = arith.constant 0 : i32
    return %arg0, %c0_i32 : i32, i32
  }
  func.func @transform_1(%arg0: i32, %arg1: i32) -> (i32, i32, i32) {
    %c0_i32 = arith.constant 0 : i32
    %c0_i32_0 = arith.constant 0 : i32
    %c0_i32_1 = arith.constant 0 : i32
    return %arg0, %c0_i32, %c0_i32_0 : i32, i32, i32
  }
  func.func @transform_2(%arg0: i32, %arg1: i32) -> (i32, i32, i32) {
    %c0_i32 = arith.constant 0 : i32
    %c0_i32_0 = arith.constant 0 : i32
    %c0_i32_1 = arith.constant 0 : i32
    return %arg1, %c0_i32, %c0_i32_0 : i32, i32, i32
  }
  func.func @transform_3(%arg0: i32, %arg1: i32) -> (i32, i32, i32) {
    %c0_i32 = arith.constant 0 : i32
    %c0_i32_0 = arith.constant 0 : i32
    %c0_i32_1 = arith.constant 0 : i32
    return %arg1, %c0_i32, %c0_i32_0 : i32, i32, i32
  }
  func.func @transform_4(%arg0: i32, %arg1: i32) -> (i32, i32, i32) {
    %c0_i32 = arith.constant 0 : i32
    %c0_i32_0 = arith.constant 0 : i32
    %c0_i32_1 = arith.constant 0 : i32
    return %arg1, %c0_i32, %c0_i32_0 : i32, i32, i32
  }
  func.func @transform_5(%arg0: i32, %arg1: i32) -> (i32, i32, i32) {
    %c0_i32 = arith.constant 0 : i32
    %c0_i32_0 = arith.constant 0 : i32
    %c0_i32_1 = arith.constant 0 : i32
    return %arg1, %c0_i32, %c0_i32_0 : i32, i32, i32
  }
  func.func @transform_6(%arg0: i32, %arg1: i32) -> (i32, i32, i32) {
    %c0_i32 = arith.constant 0 : i32
    %c0_i32_0 = arith.constant 0 : i32
    %c0_i32_1 = arith.constant 0 : i32
    return %arg1, %c0_i32, %c0_i32_0 : i32, i32, i32
  }
  func.func @transform_7(%arg0: i32, %arg1: i32) -> (i32, i32, i32) {
    %c0_i32 = arith.constant 0 : i32
    %c0_i32_0 = arith.constant 0 : i32
    %c0_i32_1 = arith.constant 0 : i32
    return %arg1, %c0_i32, %c0_i32_0 : i32, i32, i32
  }
  func.func @transform_8(%arg0: i32, %arg1: i32) -> (i32, i32, i32) {
    %c0_i32 = arith.constant 0 : i32
    %c0_i32_0 = arith.constant 0 : i32
    %c0_i32_1 = arith.constant 0 : i32
    return %arg1, %c0_i32, %c0_i32_0 : i32, i32, i32
  }
  func.func @transform_9(%arg0: i32, %arg1: i32) -> (i32, i32, i32) {
    %c0_i32 = arith.constant 0 : i32
    %c0_i32_0 = arith.constant 0 : i32
    %c0_i32_1 = arith.constant 0 : i32
    return %arg1, %c0_i32, %c0_i32_0 : i32, i32, i32
  }
  func.func @transform_10(%arg0: i32, %arg1: i32) -> (i32, i32, i32) {
    %c0_i32 = arith.constant 0 : i32
    %c0_i32_0 = arith.constant 0 : i32
    %c0_i32_1 = arith.constant 0 : i32
    return %arg1, %c0_i32, %c0_i32_0 : i32, i32, i32
  }
  func.func @transform_11(%arg0: i32, %arg1: i32) -> (i32, i32, i32) {
    %c0_i32 = arith.constant 0 : i32
    %c0_i32_0 = arith.constant 0 : i32
    %c0_i32_1 = arith.constant 0 : i32
    return %arg1, %c0_i32, %c0_i32_0 : i32, i32, i32
  }
  func.func @transform_12(%arg0: i32, %arg1: i32) -> (i32, i32, i32) {
    %c0_i32 = arith.constant 0 : i32
    %c0_i32_0 = arith.constant 0 : i32
    %c0_i32_1 = arith.constant 0 : i32
    return %arg1, %c0_i32, %c0_i32_0 : i32, i32, i32
  }
  func.func @transform_13(%arg0: i32, %arg1: i32) -> (i32, i32, i32) {
    %c0_i32 = arith.constant 0 : i32
    %c0_i32_0 = arith.constant 0 : i32
    %c0_i32_1 = arith.constant 0 : i32
    return %arg1, %c0_i32, %c0_i32_0 : i32, i32, i32
  }
  func.func @transform_14(%arg0: i32, %arg1: i32) -> (i32, i32, i32) {
    %c0_i32 = arith.constant 0 : i32
    %c0_i32_0 = arith.constant 0 : i32
    %c0_i32_1 = arith.constant 0 : i32
    return %arg1, %c0_i32, %c0_i32_0 : i32, i32, i32
  }
  func.func @transform_15(%arg0: i32, %arg1: i32) -> (i32, i32, i32) {
    %c0_i32 = arith.constant 0 : i32
    %c0_i32_0 = arith.constant 0 : i32
    %c0_i32_1 = arith.constant 0 : i32
    return %arg1, %c0_i32, %c0_i32_0 : i32, i32, i32
  }
  func.func @transform_16(%arg0: i32, %arg1: i32) -> (i32, i32, i32) {
    %c0_i32 = arith.constant 0 : i32
    %c0_i32_0 = arith.constant 0 : i32
    %c0_i32_1 = arith.constant 0 : i32
    return %arg1, %c0_i32, %c0_i32_0 : i32, i32, i32
  }
  func.func @transform_17(%arg0: i32, %arg1: i32) -> (i32, i32, i32) {
    %c0_i32 = arith.constant 0 : i32
    %c0_i32_0 = arith.constant 0 : i32
    %c0_i32_1 = arith.constant 0 : i32
    return %arg1, %c0_i32, %c0_i32_0 : i32, i32, i32
  }
  func.func @transform_18(%arg0: i32, %arg1: i32) -> (i32, i32) {
    %c0_i32 = arith.constant 0 : i32
    %c0_i32_0 = arith.constant 0 : i32
    return %arg0, %c0_i32 : i32, i32
  }
}

</mosaic_0001>

<bundles_post_ra>
// kernel: tpu_custom_call.1
= control target key start
LH: loop header
LB: loop body
LE: loop exit
PB: predicated region body
PF: predicated region fallthrough
CT: control target
= control target key end

     0   :  { %s4633_s0 = inlined_call_operand.hbm [shape: f32[16,32], index: 0, kind: input, shape index: {}]   ;;  %s4634_s1 = inlined_call_operand.vmem [shape: f32[2,1,8], index: 1, kind: input, shape index: {}]   ;;  %s4635_s2 = inlined_call_operand.vmem [shape: bf16[2,32,32], index: 2, kind: input, shape index: {}]   ;;  %s4636_s3 = inlined_call_operand.vmem [shape: f32[2,1,32], index: 3, kind: input, shape index: {}]   ;;  %s4637_s4 = inlined_call_operand.vmem [shape: bf16[2,32,32], index: 4, kind: input, shape index: {}]   ;;  %s4638_s5 = inlined_call_operand.vmem [shape: f32[2,1,32], index: 5, kind: input, shape index: {}]   ;;  %s4639_s6 = inlined_call_operand.vmem [shape: bf16[2,32,32], index: 6, kind: input, shape index: {}]   ;;  %s4640_s7 = inlined_call_operand.vmem [shape: f32[2,1,32], index: 7, kind: input, shape index: {}]   ;;  %s4641_s8 = inlined_call_operand.hbm [shape: bf16[2,32,32], index: 8, kind: input, shape index: {}]   ;;  %s4642_s9 = inlined_call_operand.vmem [shape: f32[2,1,32], index: 9, kind: input, shape index: {}]   ;;  %s4643_s10 = inlined_call_operand.vmem [shape: f32[2,1,32], index: 10, kind: input, shape index: {}]   ;;  %s4644_s11 = inlined_call_operand.vmem [shape: f32[2,1,32], index: 11, kind: input, shape index: {}]   ;;  %s4645_s12 = inlined_call_operand.hbm [shape: bf16[2,32,64], index: 12, kind: input, shape index: {}]   ;;  %s4646_s13 = inlined_call_operand.vmem [shape: f32[2,1,64], index: 13, kind: input, shape index: {}]   ;;  %s4647_s14 = inlined_call_operand.vmem [shape: bf16[2,64,32], index: 14, kind: input, shape index: {}]   ;;  %s4648_s15 = inlined_call_operand.vmem [shape: f32[2,1,32], index: 15, kind: input, shape index: {}]   ;;  %s4649_s16 = inlined_call_operand.vmem [shape: f32[2,1,32], index: 16, kind: input, shape index: {}]   ;;  %s4650_s17 = inlined_call_operand.vmem [shape: f32[2,1,32], index: 17, kind: input, shape index: {}]   ;;  %s4651_s18 = inlined_call_operand.hbm [shape: f32[16,32], index: 18, kind: output, shape index: {}]  }
   0x1   :  { %4669 = sst [smem:[#allocation19_spill]] %s4633_s0 }
   0x2   :  { %4670 = sst [smem:[#allocation20_spill]] %s4634_s1 }
   0x3   :  { %4671 = sst [smem:[#allocation21_spill]] %s4635_s2 }
   0x4   :  { %4672 = sst [smem:[#allocation22_spill]] %s4637_s4 }
   0x5   :  { %4673 = sst [smem:[#allocation23_spill]] %s4639_s6 }
   0x6   :  { %4674 = sst [smem:[#allocation24_spill]] %s4641_s8 }
   0x7   :  { %4675 = sst [smem:[#allocation25_spill]] %s4643_s10 }
   0x8   :  { %4676 = sst [smem:[#allocation26_spill]] %s4644_s11 }
   0x9   :  { %4677 = sst [smem:[#allocation27_spill]] %s4645_s12 }
   0xa   :  { %4678 = sst [smem:[#allocation28_spill]] %s4648_s15 }
   0xb   :  { %4679 = sst [smem:[#allocation29_spill]] %s4649_s16 }
   0xc   :  { %4680 = sst [smem:[#allocation30_spill]] %s4650_s17 }
   0xd   :  { %4681 = sst [smem:[#allocation31_spill]] %s4651_s18 }
   0xe   :  { %23 = vsyncpa [#allocation3], 0 }
   0xf   :  { %24 = vsyncpa [#allocation6], 0 }
  0x10   :  { %26 = vsyncpa [#allocation6 + $0x1], 0 }
  0x11   :  { %27 = vsyncpa [#allocation4], 0  ;;  %s4044_s27 = smov 0   ;;  %s4046_s28 = smov 0  }
  0x12   :  { %s4048_s29 = smov 0   ;;  %s4050_s30 = smov 0  }
  0x13   :  { %s4052_s0 = smov 0   ;;  %s4054_s19 = smov 0  }
  0x14 LB: > { %4682 = sst [smem:[#allocation12_spill]] %s3916_s28  ;;  %s42_s1 = sadd.s32 1, %s3928_s0  ;;  %s3932_s19 = sphi %s4054_s19, %s33_s19   ;;  %s3928_s0 = sphi %s4052_s0, %s4733_s0   ;;  %s3924_s30 = sphi %s4050_s30, %s4732_s30   ;;  %s3920_s29 = sphi %s4048_s29, %s4731_s29   ;;  %s3916_s28 = sphi %s4046_s28, %s4730_s28   ;;  %s3912_s27 = sphi %s4044_s27, %s4729_s27  }
  0x15   : > { %4683 = sst [smem:[#allocation13_spill]] %s3920_s29  ;;  %s260_s20 = sadd.s32 1, %s3920_s29 }
  0x16   : > { %4684 = sst [smem:[#allocation14_spill]] %s3928_s0  ;;  %p43_p0 = scmp.ge.s32.totalorder %s42_s1, 2 }
  0x17   : > { %4685 = sst [smem:[#allocation15_spill]] %s3932_s19  ;;  %p267_p1 = scmp.ne.s32.totalorder %s3920_s29, %s3916_s28 }
  0x18   : > { %p268_p2 = scmp.eq.s32.totalorder %s3932_s19, 0  ;;  %s4735_s1 = smov (%p43_p0, %s42_s1), 0 }
  0x19   : > { %4686 = sst [smem:[#allocation16_spill]] %s4735_s1  ;;  %p3643_p4 = scmp.lt.s32.totalorder %s3932_s19, 2 }
  0x1a   : > { %p269_p3 = por %p268_p2, %p267_p1  ;;  %s257_s21 = ssub.s32 %s3928_s0, %s4735_s1 }
  0x1b   : > { %s623_s22 = sand.u32 1, %s3932_s19   ;;  %p258_p5 = scmp.eq.s32.totalorder %s257_s21, 0 }
  0x1c   : > { %s625_s2 = sand.u32 1, %s3920_s29   ;;  %s4656_s23 = sshll.u32 %s3928_s0, 8 }
  0x1d   : > { %s4088_s24 = scalar_select %p258_p5, %s3920_s29, %s260_s20  }
  0x1e   : > { %s4090_s25 = sshll.u32 %s625_s2, 4  ;;  %s4688_s8 = sld [smem:[#allocation24_spill]] }
  0x1f   : > { %4687 = sst [smem:[#allocation17_spill]] %s4088_s24  ;;  %p4099_p6 = pnand %p3643_p4, %p269_p3 }
  0x20   : > { %s627_s20 = scalar_lea.vmem [#allocation5], %s4090_s25  ;;  %s4106_s2 = scalar_lea.sflag [#allocation6], %s623_s22 }
  0x21   : > { %s634_s21 = sshll.u32 %s627_s20, 4  ;;  %p3762_p8 = pneg %p4099_p6  ;;  %s4104_s21 = int_to_ptr.vmem [resolvable:$true] %s634_s21 }
  0x24   : > { %s4097_s17 = scalar_lea.hbm %s4688_s8, %s4656_s23  ;;  %s3765_s24 = scalar_lea.hbm %s4688_s8, 512 }
  0x25   : > { %s3760_s18 = scalar_lea.hbm %s4097_s17, 256  ;;  %p3766_p11 = scmp.lt.u32.totalorder %s4097_s17, %s4688_s8 }
  0x26   : > { %p3761_p7 = scmp.ne.s32.totalorder %s4097_s17, %s3760_s18  ;;  %p3767_p12 = scmp.lt.u32.totalorder %s3765_s24, %s3760_s18 }
  0x27   : > { %p3769_p0 = scmp.lt.u32.totalorder %s3760_s18, %s4097_s17 }
  0x28   : > { %p3763_p9 = pnand %p3762_p8, %p3761_p7  ;;  %p3768_p13 = por %p3767_p12, %p3766_p11 }
  0x2a   : > { %p3764_p10 = pneg %p3763_p9  ;;  %p3770_p1 = por %p3769_p0, %p3768_p13 }
  0x2c   : > { %p3771_p2 = pnand %p3770_p1, %p3764_p10 }
  0x2e   : > { %3774 = shalt.err (!%p3771_p2)
}
  0x2f   : > { %s3775_s22 = scalar_lea.vmem %s4104_s21, 256  ;;  %s3934_s23 = smov [#allocation5]  }
  0x30   : > { %p3776_p3 = scmp.ne.s32.totalorder %s4104_s21, %s3775_s22  ;;  %s3780_s20 = sshll.u32 %s3934_s23, 4  ;;  %s3781_s20 = int_to_ptr.vmem [resolvable:$false] %s3780_s20 }
  0x31   : > { %s3782_s16 = scalar_lea.vmem %s3781_s20, 512  ;;  %p3783_p7 = scmp.lt.s32.totalorder %s4104_s21, %s3781_s20 }
  0x32   : > { %p3778_p4 = pnand %p3776_p3, %p3762_p8  ;;  %p3784_p9 = scmp.lt.s32.totalorder %s3782_s16, %s3775_s22 }
  0x34   : > { %p3779_p5 = pneg %p3778_p4  ;;  %p3785_p11 = por %p3784_p9, %p3783_p7 }
  0x36   : > { %p3786_p12 = pnand %p3785_p11, %p3779_p5 }
  0x38   : > { %3789 = shalt.err (!%p3786_p12)
}
  0x39   : > { %s4658_s29 = smov 64   ;;  %s4659_s24 = smov 4  }
  0x3a   : > { %3638 = dma.hbm_to_vmem [thread:$0]  (!%p4099_p6), %s4097_s17, 256, %s4104_s21, %s4106_s2, %s4658_s29, %s4658_s29, %s4659_s24  }
  0x3b   : > { %s666_s18 = scalar_lea.vmem [#allocation7], %s4090_s25  ;;  %s4139_s22 = sadd.s32 4294967295, %s3932_s19  }
  0x3c   : > { %s673_s26 = sshll.u32 %s666_s18, 4  ;;  %4690 = sst [smem:[#allocation18_spill]] %s4139_s22  ;;  %s4163_s26 = int_to_ptr.vmem [resolvable:$true] %s673_s26 }
  0x3d   : > { %p273_p10 = scmp.ne.s32.totalorder %s3916_s28, %s3912_s27  ;;  %p4660_p13 = scmp.eq.s32.totalorder %s4139_s22, 0 }
  0x3e   : > { %p3305_p0 = scmp.ge.s32.totalorder %s3932_s19, 1  ;;  %p544_p1 = scmp.lt.s32.totalorder %s3932_s19, 3 }
  0x3f   : > { %p4148_p2 = por %p4660_p13, %p273_p10  ;;  %s4693_s17 = sshll.u32 %s3928_s0, 8 }
  0x40   : > { %p4152_p3 = pnand %p3305_p0, %p544_p1  ;;  %s4694_s12 = sld [smem:[#allocation27_spill]] }
  0x41   : > { %s4691_s23 = scalar_select %p4148_p2, 1, 0 }
  0x42   : > { %s4692_s20 = scalar_select %p4152_p3, 1, 0 }
  0x43   : > { %s3937_s27 = smov [#allocation2]   ;;  %p3631_p4 = pneg %p4152_p3 }
  0x44   : > { %s559_s18 = sshll.u32 %s3937_s27, 4  ;;  %s4167_s18 = int_to_ptr.vmem [resolvable:$true] %s559_s18 }
  0x45   : > { %p4171_p5 = pnand %p3631_p4, %p4660_p13 }
  0x46   : > { %s4161_s16 = scalar_lea.hbm %s4694_s12, %s4693_s17  ;;  %s3795_s27 = scalar_lea.hbm %s4694_s12, 512 }
  0x47   : > { %s3790_s25 = scalar_lea.hbm %s4161_s16, 256  ;;  %p3796_p12 = scmp.lt.u32.totalorder %s4161_s16, %s4694_s12 }
  0x48   : > { %p3791_p7 = scmp.ne.s32.totalorder %s4161_s16, %s3790_s25  ;;  %p3797_p10 = scmp.lt.u32.totalorder %s3795_s27, %s3790_s25 }
  0x49   : > { %p3799_p1 = scmp.lt.u32.totalorder %s3790_s25, %s4161_s16 }
  0x4a   : > { %p3793_p9 = pnand %p3791_p7, %p3762_p8  ;;  %p3798_p0 = por %p3797_p10, %p3796_p12 }
  0x4c   : > { %p3794_p11 = pneg %p3793_p9  ;;  %p3800_p4 = por %p3799_p1, %p3798_p0 }
  0x4e   : > { %p3801_p13 = pnand %p3800_p4, %p3794_p11 }
  0x50   : > { %3804 = shalt.err (!%p3801_p13)
}
  0x51   : > { %s3805_s0 = scalar_lea.vmem %s4163_s26, 256  ;;  %s3938_s17 = smov [#allocation7]  }
  0x52   : > { %p3806_p7 = scmp.ne.s32.totalorder %s4163_s26, %s3805_s0  ;;  %s3810_s21 = sshll.u32 %s3938_s17, 4  ;;  %s3811_s21 = int_to_ptr.vmem [resolvable:$false] %s3810_s21 }
  0x53   : > { %s3812_s8 = scalar_lea.vmem %s3811_s21, 512  ;;  %p3813_p3 = scmp.lt.s32.totalorder %s4163_s26, %s3811_s21 }
  0x54   : > { %p3808_p9 = pnand %p3806_p7, %p3762_p8  ;;  %p3814_p12 = scmp.lt.s32.totalorder %s3812_s8, %s3805_s0 }
  0x56   : > { %p3809_p2 = pneg %p3808_p9  ;;  %p3815_p10 = por %p3814_p12, %p3813_p3 }
  0x58   : > { %p3816_p0 = pnand %p3815_p10, %p3809_p2 }
  0x5a   : > { %3819 = shalt.err (!%p3816_p0)
}
  0x5b   : > { %s4696_s24 = smov 4   ;;  %s4697_s25 = smov 64  }
  0x5c   : > { %3641 = dma.hbm_to_vmem [thread:$0]  (!%p4099_p6), %s4161_s16, 256, %s4163_s26, %s4106_s2, %s4697_s25, %s4697_s25, %s4696_s24  }
  0x5d   : > { %s4698_s17 = sld [smem:[#allocation19_spill]]  ;;  %p3822_p13 = pneg %p4171_p5 }
  0x63   : > { %s3820_s19 = scalar_lea.hbm %s4698_s17, 256 }
  0x64   : > { %p3821_p8 = scmp.ne.s32.totalorder %s4698_s17, %s3820_s19  ;;  %p3827_p11 = scmp.lt.u32.totalorder %s3820_s19, %s4698_s17 }
  0x66   : > { %p3823_p2 = pnand %p3822_p13, %p3821_p8 }
  0x68   : > { %p3824_p3 = pneg %p3823_p2 }
  0x6a   : > { %p3829_p1 = pnand %p3827_p11, %p3824_p3 }
  0x6c   : > { %3832 = shalt.err (!%p3829_p1)
}
  0x6d   : > { %s3833_s2 = scalar_lea.vmem %s4167_s18, 256  ;;  %p3841_p9 = scmp.lt.s32.totalorder %s4167_s18, %s4167_s18 }
  0x6e   : > { %p3834_p6 = scmp.ne.s32.totalorder %s4167_s18, %s3833_s2  ;;  %p3842_p12 = scmp.lt.s32.totalorder %s3833_s2, %s3833_s2 }
  0x70   : > { %p3836_p4 = pnand %p3834_p6, %p3822_p13  ;;  %p3843_p10 = por %p3842_p12, %p3841_p9 }
  0x72   : > { %p3837_p7 = pneg %p3836_p4 }
  0x74   : > { %p3844_p0 = pnand %p3843_p10, %p3837_p7 }
  0x76   : > { %3847 = shalt.err (!%p3844_p0)
}
  0x77   : > { %s3939_s12 = smov 128   ;;  %s3940_s15 = smov 8  }
  0x78   : > { %3634 = dma.hbm_to_vmem [thread:$0]  (!%p4171_p5), %s4698_s17, 256, %s4167_s18, [#allocation3], %s3939_s12, %s3939_s12, %s3940_s15  }
  0x79   : > { %p4699_p8 = scmp.ne.s32.totalorder %s4692_s20, 0 }
  0x7a   : > { %p4700_p13 = scmp.eq.s32.totalorder (!%p4699_p8), %s4139_s22, 0 }
  0x7b   : > { %717 = sbr.rel (%p4699_p8) target bundleno = 4260 (0x10a4), region = 92 }
  0x82   : > { %3899 = dma.done.wait (%p4700_p13), [#allocation3], 256   ;;  %p4701_p2 = pmov %p4700_p13 }
  0x83   : > { %s723_s16 = sand.u32 1, %s4139_s22   ;;  %s725_s8 = sand.u32 1, %s3916_s28  }
  0x84   : > { %3901 = vsyncadd (%p4701_p2), [#allocation3], 4294967040  ;;  %s4231_s24 = sshll.u32 %s725_s8, 4  ;;  %s724_s29 = scalar_lea.sflag [#allocation6], %s723_s16 }
  0x85   : > { %p4702_p5 = scmp.ne.s32.totalorder %s4691_s23, 0 }
  0x87   : > { %3903 = dma.done.wait (%p4702_p5), %s724_s29, 512  }
  0x88   : > { %3905 = vsyncadd (%p4702_p5), %s724_s29, 4294966784  ;;  %p849_p3 = scmp.lt.s32.totalorder %s3924_s30, 1  ;;  %s4703_s2 = sld [smem:[#allocation21_spill]] }
  0x89   : > { %s4704_s4 = sld [smem:[#allocation22_spill]]  ;;  %s4705_s6 = sld [smem:[#allocation23_spill]] }
  0x8a   : > { %s4240_s20 = scalar_select %p849_p3, %s3924_s30, 1 }
  0x8b   : > { %s4710_s8 = sld [smem:[#allocation30_spill]]  ;;  %s736_s29 = scalar_lea.vmem [#allocation7], %s4231_s24 }
  0x8c   : > { %s3395_s18 = sshll.u32 %s4240_s20, 4  ;;  %s884_s25 = scalar_lea.vmem %s4646_s13, %s4240_s20 }
  0x8d   : > { %p3327_p11 = scmp.ne.s32.totalorder %s3924_s30, 0 }
  0x8e   : > { %s853_s12 = scalar_lea.vmem %s4703_s2, %s3395_s18  ;;  %s4708_s2 = sld [smem:[#allocation28_spill]]  ;;  %v905_v0 = vld [vmem:[#allocation2] sm:$0xff] (!%p3327_p11)  ;;  %vm907_vm0 = vcmask (!%p3327_p11), 261120   ;;  %v906_v1 = vld [vmem:[#allocation2 + $0x8] sm:$0xff] (!%p3327_p11) }
  0x8f   : > { %s4253_s26 = scalar_lea.vmem %s4704_s4, %s3395_s18  ;;  %s4262_s28 = scalar_lea.vmem %s4705_s6, %s3395_s18  ;;  %908 = vst.msk [vmem:[#allocation8] sm:$0xff] (!%p3327_p11), %vm907_vm0, %v905_v0  ;;  %909 = vst.msk [vmem:[#allocation8 + $0x8] sm:$0xff] (!%p3327_p11), %vm907_vm0, %v906_v1 }
  0x90   : > { %s3398_s18 = sshll.u32 %s4240_s20, 5  ;;  %s4709_s4 = sld [smem:[#allocation29_spill]] }
  0x91   : > { %s4288_s27 = scalar_lea.vmem %s4647_s14, %s3398_s18  ;;  %s898_s11 = scalar_lea.vmem %s4710_s8, %s4240_s20 }
  0x92   : > { %904 = sbr.rel (%p3327_p11) target bundleno = 153 (0x99), region = 108 }
  0x94   : > { %s892_s21 = scalar_lea.vmem %s4708_s2, %s4240_s20 }
  0x96   : > { %s895_s10 = scalar_lea.vmem %s4709_s4, %s4240_s20 }
  0x99 PF: > { %v3708_v2 = vld [vmem:[%s853_s12] sm:$0xff]   ;;  %v3941_v3 = vmov 0.0   ;;  %v3709_v4 = vld [vmem:[%s853_s12 + $0x8] sm:$0xff]   ;;  %vm3942_vm1 = vmmov 0   ;;  %v4308_v5 = vld [vmem:[#allocation8] sm:$0xff]  ;;  %vm938_vm2 = vcmask 261120   ;;  %s4711_s30 = scalar_lea.vmem %s4638_s5, %s4240_s20  ;;  %s4712_s2 = scalar_lea.vmem %s4636_s3, %s4240_s20 }
  0x9a   : > { %3469 = vmatprep.subr.bf16.mxu1 %v3941_v3  ;;  %3485 = vmatprep.subr.bf16.mxu0 %v3941_v3  ;;  %v4310_v6 = vld [vmem:[#allocation8 + $0x8] sm:$0xff]  ;;  %v3710_v7 = vld [vmem:[%s4253_s26] sm:$0xff]   ;;  %v3711_v9 = vld [vmem:[%s4253_s26 + $0x8] sm:$0xff]   ;;  %vm1131_vm3 = vcmask 64512   ;;  %s3943_s8 = smov 120   ;;  %s4713_s23 = sld [smem:[#allocation20_spill]] }
  0x9b   : > { %3470 = vmatpush3.bf16.msra.mxu1 %v3708_v2  ;;  %3473 = vmatprep.mubr.msk.bf16.mxu1 %vm3942_vm1, %v3941_v3  ;;  %v912_v8 = vpack.c.bf16 %v4310_v6, %v4308_v5  ;;  %v3332_v14 = vld [vmem:[%s4711_s30] ss:$0 sm:$0xff]  ;;  %v3713_v25 = vld [vmem:[%s4262_s28 + $0x8] sm:$0xff]   ;;  %s4714_s19 = scalar_lea.vmem %s4640_s7, %s4240_s20  ;;  %s3944_s22 = smov 112   ;;  %vm2954_vm4 = vcmask 523264  }
  0x9c   : > { %3471 = vmatprep.subr.bf16.mxu1 %v3941_v3  ;;  %3489 = vmatprep.mubr.msk.bf16.mxu0 %vm3942_vm1, %v3941_v3  ;;  %v3328_v16 = vld [vmem:[%s4712_s2] ss:$0 sm:$0xff]  ;;  %s4715_s16 = scalar_lea.vmem [#allocation5], %s4231_s24  ;;  %s3945_s4 = smov 104  }
  0x9d   : > { %v3712_v24 = vld [vmem:[%s4262_s28] sm:$0xff]   ;;  %s4716_s6 = smov %s4715_s16  ;;  %s4717_s26 = scalar_lea.vmem %s4642_s9, %s4240_s20 }
  0x9e   : > { %3486 = vmatpush3.bf16.msra.mxu0 %v3712_v24  ;;  %v3336_v46 = vld [vmem:[%s4714_s19] ss:$0 sm:$0xff]  ;;  %s4718_s2 = sld [smem:[#allocation25_spill]]  ;;  %s4720_s28 = sld [smem:[#allocation26_spill]] }
  0x9f   : > { %3472 = vmatpush3.bf16.msra.mxu1 %v3709_v4  ;;  %3487 = vmatprep.subr.bf16.mxu0 %v3941_v3 }
  0xa0   : > { %3477 = vmatprep.subr.bf16.mxu1 %v3941_v3  ;;  %v4374_v29 = vld [vmem:[%s4713_s23 + $0x1] ss:$0 sm:$0xff]  ;;  %v4381_v38 = vld [vmem:[%s4713_s23] ss:$0 sm:$0xff] }
  0xa2   : > { %3474 = vmatmul.mubr.msk.bf16.vlgmr.msra.gmra.mrb[0].mxu1 %vm938_vm2, %v912_v8  ;;  %3488 = vmatpush3.bf16.msra.mxu0 %v3713_v25 }
  0xa3   : > { %3478 = vmatpush3.bf16.msra.mxu1 %v3710_v7  ;;  %3481 = vmatprep.mubr.msk.bf16.mxu1 %vm3942_vm1, %v3941_v3 }
  0xa4   : > { %3479 = vmatprep.subr.bf16.mxu1 %v3941_v3  ;;  %3503 = vmatprep.subr.mxu0 %v3941_v3  ;;  %s4721_s0 = scalar_lea.vmem %s4720_s28, %s4240_s20 }
  0xa5   : > { %3490 = vmatmul.mubr.msk.bf16.vlgmr.msra.gmra.mrb[0].mxu0 %vm938_vm2, %v912_v8 }
  0xa6   : > { %3505 = vmatprep.mubr.msk.f32.mxu0 %vm3942_vm1, %v3941_v3 }
  0xa7   : > { %3480 = vmatpush3.bf16.msra.mxu1 %v3711_v9 }
  0xa8   : > { %3493 = vmatprep.subr.mxu1 %v3941_v3 }
  0xaa   : > { %3482 = vmatmul.mubr.msk.bf16.vlgmr.msra.gmra.mrb[4].mxu1 %vm938_vm2, %v912_v8 }
  0xab   : > { %3495 = vmatprep.mubr.msk.f32.mxu1 %vm3942_vm1, %v3941_v3 }
 0x175   : > { %v976_v10 = vpop.f32.mrb[0].mxu1 }
 0x176   : > { %v3475_v11 = vpop.f32.mrb[1].mxu1  ;;  %v4344_v22 = vadd.f32 %v3328_v16, %v976_v10 }
 0x177   : > { %v979_v12 = vpop.f32.mrb[2].mxu1 }
 0x178   : > { %v3476_v13 = vpop.f32.mrb[3].mxu1  ;;  %v4351_v23 = vadd.f32 %v3328_v16, %v979_v12  ;;  %v1104_v43 = vpop.f32.mrb[0].mxu0 }
 0x179   : > { %v3491_v44 = vpop.f32.mrb[1].mxu0  ;;  %v4391_v48 = vadd.f32 %v3336_v46, %v1104_v43 }
 0x17a   : > { %v1107_v45 = vpop.f32.mrb[2].mxu0 }
 0x17b   : > { %v3492_v47 = vpop.f32.mrb[3].mxu0  ;;  %v4393_v49 = vadd.f32 %v3336_v46, %v1107_v45  ;;  %3504 = vmatpush3.msra.mxu0 %v4391_v48 }
 0x17c   : > { %3513 = vmatprep.subr.mxu0 %v3941_v3 }
 0x17d   : > { %v1040_v15 = vpop.f32.mrb[4].mxu1 }
 0x17e   : > { %v4338_v17 = vadd.f32 %v3332_v14, %v1040_v15  ;;  %v3483_v18 = vpop.f32.mrb[5].mxu1 }
 0x17f   : > { %v1043_v19 = vpop.f32.mrb[6].mxu1 }
 0x180   : > { %v4340_v20 = vadd.f32 %v3332_v14, %v1043_v19  ;;  %v3484_v21 = vpop.f32.mrb[7].mxu1  ;;  %3494 = vmatpush3.xpose.msk.msra.mxu1 %vm1131_vm3, %v4338_v17 }
 0x181   : > { %3498 = vmatprep.subr.mxu1 %v3941_v3 }
 0x182   : > { %1536 = vrot.lane.b32.xlu1 %v4340_v20, %s3943_s8 }
 0x183   : > { %3496 = vmatmul.mubr.msk.f32.vlgmr.msra.gmra.mrb[8].mxu1 %vm1131_vm3, %v4344_v22 }
 0x184   : > { %3499 = vmatpush3.xpose.msk.msra.mxu1 %vm1131_vm3, %v4340_v20  ;;  %3500 = vmatprep.mubr.msk.f32.mxu1 %vm3942_vm1, %v3941_v3 }
 0x185   : > { %3508 = vmatprep.subr.mxu1 %v3941_v3 }
 0x186   : > { %1534 = vrot.lane.b32.xlu1 %v4351_v23, %s3943_s8 }
 0x187   : > { %3501 = vmatmul.mubr.msk.f32.vlgmr.msra.gmra.mrb[10].mxu1 %vm1131_vm3, %v4351_v23 }
 0x188   : > { %3510 = vmatprep.mubr.msk.f32.mxu1 %vm3942_vm1, %v3941_v3  ;;  %3509 = vmatpush3.msra.mxu1 %v4393_v49 }
 0x189   : > { %3518 = vmatprep.subr.mxu1 %v3941_v3 }
 0x1f4   : > { %v1537_v55 = vpop.permute.xlu1 %1536 }
 0x1f8   : > { %v1535_v57 = vpop.permute.xlu1 %1534 }
 0x256   : > { %v1204_v26 = vpop.f32.mrb[8].mxu1 }
 0x257   : > { %v3497_v27 = vpop.f32.mrb[9].mxu1  ;;  %v1284_v37 = vmul.f32 0.35355338, %v1204_v26 }
 0x259   : > { %v1286_v41 = vadd.f32 %v4381_v38, %v1284_v37 }
 0x25a   : > { %v1280_v28 = vpop.f32.mrb[10].mxu1 }
 0x25b   : > { %v1285_v30 = vmul.f32 0.35355338, %v1280_v28  ;;  %v3502_v31 = vpop.f32.mrb[11].mxu1  ;;  %v1288_v42 = vsel %vm1131_vm3, %v1286_v41, -inf }
 0x25d   : > { %v1287_v32 = vadd.f32 %v4374_v29, %v1285_v30 }
 0x25f   : > { %v1291_v33 = vsel %vm1131_vm3, %v1287_v32, -inf }
 0x260   : > { %1292 = vmax.xlane.f32.xlu0 %v1291_v33 }
 0x2ed   : > { %v1293_v34 = vpop.xlane.xlu0 %1292 }
 0x2ee   : > { %v1295_v35 = vsub.f32 %v1287_v32, %v1293_v34 }
 0x2f0   : > { %v1298_v36 = vmul.f32 1.442695, %v1295_v35 }
 0x2f2   : > { %3720 = vpow2.f32 %v1298_v36 }
 0x2fc   : > { %v3721_v39 = vpop.eup %3720 }
 0x2fd   : > { %v1303_v40 = vsel %vm1131_vm3, %v3721_v39, 0.0 }
 0x2fe   : > { %1304 = vadd.xlane.f32.xlu0 %v1303_v40 }
 0x302   : > { %1289 = vmax.xlane.f32.xlu0 %v1288_v42 }
 0x318   : > { %1458 = vrot.lane.b32.xlu0 %v4338_v17, %s3943_s8 }
 0x31c   : > { %1456 = vrot.lane.b32.xlu0 %v4344_v22, %s3943_s8 }
 0x38b   : > { %v1305_v50 = vpop.xlane.xlu0 %1304 }
 0x38c   : > { %3722 = vrcp.f32 %v1305_v50 }
 0x38f   : > { %v1290_v51 = vpop.xlane.xlu0 %1289 }
 0x390   : > { %v1294_v52 = vsub.f32 %v1286_v41, %v1290_v51 }
 0x392   : > { %v1296_v53 = vmul.f32 1.442695, %v1294_v52 }
 0x393   : > { %v1459_v63 = vpop.permute.xlu0 %1458 }
 0x394   : > { %3724 = vpow2.f32 %v1296_v53 }
 0x396   : > { %v3723_v54 = vpop.eup %3722 }
 0x397   : > { %v1309_v56 = vmul.f32 %v3723_v54, %v3721_v39  ;;  %v1457_v1 = vpop.permute.xlu0 %1456 }
 0x399   : > { %3511 = vmatmul.mubr.msk.f32.vlgmr.msra.gmra.mrb[12].mxu1 %vm1131_vm3, %v1309_v56 }
 0x39a   : > { %3519 = vmatpush3.xpose.msk.msra.mxu1 %vm1131_vm3, %v1537_v55  ;;  %3520 = vmatprep.mubr.msk.f32.mxu1 %vm3942_vm1, %v3941_v3 }
 0x39b   : > { %3528 = vmatprep.subr.mxu1 %v3941_v3 }
 0x39d   : > { %3521 = vmatmul.mubr.msk.f32.vlgmr.msra.gmra.mrb[14].mxu1 %vm1131_vm3, %v1535_v57 }
 0x39e   : > { %v3725_v58 = vpop.eup %3724  ;;  %3530 = vmatprep.mubr.msk.f32.mxu1 %vm3942_vm1, %v3941_v3 }
 0x39f   : > { %v1300_v59 = vsel %vm1131_vm3, %v3725_v58, 0.0 }
 0x3a0   : > { %1301 = vadd.xlane.f32.xlu1 %v1300_v59 }
 0x3b1   : > { %1716 = vrot.lane.b32.xlu1 %v4393_v49, %s3943_s8 }
 0x3b5   : > { %1956 = vrot.lane.b32.xlu1 %v4338_v17, %s3944_s22 }
 0x3b9   : > { %2034 = vrot.lane.b32.xlu1 %v4340_v20, %s3944_s22 }
 0x42d   : > { %v1302_v60 = vpop.xlane.xlu1 %1301 }
 0x42e   : > { %3726 = vrcp.f32 %v1302_v60  ;;  %v3400_v60 = vld [vmem:[%s4715_s16] sm:$0xff]  }
 0x431   : > { %v1717_v61 = vpop.permute.xlu1 %1716 }
 0x432   : > { %3529 = vmatpush3.msra.mxu1 %v1717_v61  ;;  %v3402_v61 = vunpack.c.h.bf16 %v3400_v60 }
 0x433   : > { %3543 = vmatprep.subr.mxu1 %v3941_v3 }
 0x435   : > { %v1957_v28 = vpop.permute.xlu1 %1956 }
 0x438   : > { %v3727_v62 = vpop.eup %3726 }
 0x439   : > { %v1308_v0 = vmul.f32 %v3727_v62, %v3725_v58  ;;  %v2035_v30 = vpop.permute.xlu1 %2034  ;;  %v3401_v62 = vunpack.c.l.bf16 %v3400_v60 }
 0x43b   : > { %3506 = vmatmul.mubr.msk.f32.vlgmr.msra.gmra.mrb[4].mxu0 %vm1131_vm3, %v1308_v0 }
 0x43c   : > { %3514 = vmatpush3.xpose.msk.msra.mxu0 %vm1131_vm3, %v1459_v63  ;;  %3515 = vmatprep.mubr.msk.f32.mxu0 %vm3942_vm1, %v3941_v3 }
 0x43d   : > { %3523 = vmatprep.subr.mxu0 %v3941_v3 }
 0x43f   : > { %3516 = vmatmul.mubr.msk.f32.vlgmr.msra.gmra.mrb[6].mxu0 %vm1131_vm3, %v1457_v1 }
 0x440   : > { %3525 = vmatprep.mubr.msk.f32.mxu0 %vm3942_vm1, %v3941_v3 }
 0x46c   : > { %v4427_v2 = vpop.f32.mrb[12].mxu1 }
 0x46d   : > { %v3512_v4 = vpop.f32.mrb[13].mxu1 }
 0x470   : > { %v1608_v7 = vpop.f32.mrb[14].mxu1 }
 0x471   : > { %v1613_v8 = vmul.f32 0.35355338, %v1608_v7  ;;  %v3522_v9 = vpop.f32.mrb[15].mxu1 }
 0x473   : > { %v1615_v10 = vadd.f32 %v4374_v29, %v1613_v8 }
 0x475   : > { %v1619_v11 = vsel %vm1131_vm3, %v1615_v10, -inf }
 0x476   : > { %1620 = vmax.xlane.f32.xlu0 %v1619_v11 }
 0x48c   : > { %1954 = vrot.lane.b32.xlu0 %v4344_v22, %s3944_s22 }
 0x503   : > { %v1621_v12 = vpop.xlane.xlu0 %1620 }
 0x504   : > { %v1623_v13 = vsub.f32 %v1615_v10, %v1621_v12 }
 0x506   : > { %v1626_v14 = vmul.f32 1.442695, %v1623_v13 }
 0x507   : > { %v1955_v34 = vpop.permute.xlu0 %1954 }
 0x508   : > { %3728 = vpow2.f32 %v1626_v14 }
 0x50e   : > { %v4433_v15 = vpop.f32.mrb[4].mxu0 }
 0x50f   : > { %v3507_v16 = vpop.f32.mrb[5].mxu0 }
 0x512   : > { %v3729_v18 = vpop.eup %3728  ;;  %v1530_v19 = vpop.f32.mrb[6].mxu0 }
 0x513   : > { %v3517_v21 = vpop.f32.mrb[7].mxu0  ;;  %v1631_v24 = vsel %vm1131_vm3, %v3729_v18, 0.0  ;;  %v1612_v25 = vmul.f32 0.35355338, %v1530_v19 }
 0x514   : > { %1632 = vadd.xlane.f32.xlu1 %v1631_v24 }
 0x515   : > { %v1614_v26 = vadd.f32 %v4381_v38, %v1612_v25 }
 0x517   : > { %v1616_v27 = vsel %vm1131_vm3, %v1614_v26, -inf }
 0x525   : > { %2032 = vrot.lane.b32.xlu1 %v4351_v23, %s3944_s22 }
 0x549   : > { %1617 = vmax.xlane.f32.xlu1 %v1616_v27 }
 0x55a   : > { %1639 = vrot.lane.b32.xlu1 %v4391_v48, %s3943_s8  ;;  %s4719_s8 = scalar_lea.vmem %s4718_s2, %s4240_s20 }
 0x5a1   : > { %v1633_v31 = vpop.xlane.xlu1 %1632 }
 0x5a2   : > { %3730 = vrcp.f32 %v1633_v31 }
 0x5a5   : > { %v2033_v35 = vpop.permute.xlu1 %2032 }
 0x5ac   : > { %v3731_v32 = vpop.eup %3730 }
 0x5ad   : > { %v1637_v33 = vmul.f32 %v3731_v32, %v3729_v18 }
 0x5af   : > { %3531 = vmatmul.mubr.msk.f32.vlgmr.msra.gmra.mrb[16].mxu1 %vm1131_vm3, %v1637_v33 }
 0x5b0   : > { %3544 = vmatpush3.xpose.msk.msra.mxu1 %vm1131_vm3, %v1957_v28  ;;  %3545 = vmatprep.mubr.msk.f32.mxu1 %vm3942_vm1, %v3941_v3 }
 0x5b1   : > { %3548 = vmatprep.subr.mxu1 %v3941_v3 }
 0x5b3   : > { %3546 = vmatmul.mubr.msk.f32.vlgmr.msra.gmra.mrb[18].mxu1 %vm1131_vm3, %v1955_v34 }
 0x5b4   : > { %3549 = vmatpush3.xpose.msk.msra.mxu1 %vm1131_vm3, %v2035_v30  ;;  %3550 = vmatprep.mubr.msk.f32.mxu1 %vm3942_vm1, %v3941_v3 }
 0x5b5   : > { %3558 = vmatprep.subr.mxu1 %v3941_v3 }
 0x5b7   : > { %3551 = vmatmul.mubr.msk.f32.vlgmr.msra.gmra.mrb[20].mxu1 %vm1131_vm3, %v2033_v35 }
 0x5b8   : > { %3560 = vmatprep.mubr.msk.f32.mxu1 %vm3942_vm1, %v3941_v3 }
 0x5d6   : > { %v1618_v36 = vpop.xlane.xlu1 %1617 }
 0x5d7   : > { %v1622_v37 = vsub.f32 %v1614_v26, %v1618_v36 }
 0x5d9   : > { %v1624_v39 = vmul.f32 1.442695, %v1622_v37 }
 0x5da   : > { %v1640_v40 = vpop.permute.xlu1 %1639 }
 0x5db   : > { %3732 = vpow2.f32 %v1624_v39  ;;  %3524 = vmatpush3.msra.mxu0 %v1640_v40 }
 0x5dc   : > { %3533 = vmatprep.subr.mxu0 %v3402_v61 }
 0x5e5   : > { %v3733_v41 = vpop.eup %3732 }
 0x5e6   : > { %v1628_v42 = vsel %vm1131_vm3, %v3733_v41, 0.0 }
 0x5e7   : > { %1629 = vadd.xlane.f32.xlu0 %v1628_v42 }
 0x674   : > { %v1630_v43 = vpop.xlane.xlu0 %1629 }
 0x675   : > { %3734 = vrcp.f32 %v1630_v43 }
 0x67f   : > { %v3735_v44 = vpop.eup %3734 }
 0x680   : > { %v1636_v45 = vmul.f32 %v3735_v44, %v3733_v41 }
 0x682   : > { %3526 = vmatmul.mubr.msk.f32.vlgmr.msra.gmra.mrb[8].mxu0 %vm1131_vm3, %v1636_v45  ;;  %v1788_v46 = vpop.f32.mrb[16].mxu1 }
 0x683   : > { %v3532_v47 = vpop.f32.mrb[17].mxu1  ;;  %3534 = vmatpush3.msra.mxu0 %v3402_v61 }
 0x684   : > { %3538 = vmatprep.subr.mxu0 %v3401_v62 }
 0x686   : > { %v2028_v50 = vpop.f32.mrb[18].mxu1 }
 0x687   : > { %v2110_v51 = vmul.f32 0.35355338, %v2028_v50  ;;  %v3547_v52 = vpop.f32.mrb[19].mxu1 }
 0x689   : > { %v2112_v53 = vadd.f32 %v4381_v38, %v2110_v51 }
 0x68a   : > { %v2106_v54 = vpop.f32.mrb[20].mxu1 }
 0x68b   : > { %v2111_v55 = vmul.f32 0.35355338, %v2106_v54  ;;  %v3552_v56 = vpop.f32.mrb[21].mxu1  ;;  %v2114_v57 = vsel %vm1131_vm3, %v2112_v53, -inf }
 0x68c   : > { %2115 = vmax.xlane.f32.xlu0 %v2114_v57 }
 0x68d   : > { %v2113_v58 = vadd.f32 %v4374_v29, %v2111_v55 }
 0x68f   : > { %v2117_v59 = vsel %vm1131_vm3, %v2113_v58, -inf }
 0x690   : > { %2118 = vmax.xlane.f32.xlu0 %v2117_v59 }
 0x719   : > { %v2116_v63 = vpop.xlane.xlu0 %2115 }
 0x71a   : > { %v2120_v0 = vsub.f32 %v2112_v53, %v2116_v63 }
 0x71c   : > { %v2122_v1 = vmul.f32 1.442695, %v2120_v0 }
 0x71d   : > { %v2119_v4 = vpop.xlane.xlu0 %2118 }
 0x71e   : > { %3736 = vpow2.f32 %v2122_v1  ;;  %v2121_v7 = vsub.f32 %v2113_v58, %v2119_v4  ;;  %v3374_v1 = vld [vmem:[%s4717_s26] ss:$0 sm:$0xff]  ;;  %s3946_s26 = smov [#allocation8]  }
 0x71f   : > { %s3056_s24 = sshll.u32 %s3946_s26, 4  ;;  %s3057_s24 = int_to_ptr.vmem [resolvable:$true] %s3056_s24 }
 0x720   : > { %v2124_v8 = vmul.f32 1.442695, %v2121_v7  ;;  %p3855_p9 = scmp.lt.s32.totalorder %s3057_s24, %s3057_s24 }
 0x722   : > { %3738 = vpow2.f32 %v2124_v8 }
 0x728   : > { %v3737_v9 = vpop.eup %3736 }
 0x729   : > { %v2126_v10 = vsel %vm1131_vm3, %v3737_v9, 0.0 }
 0x72a   : > { %2127 = vadd.xlane.f32.xlu0 %v2126_v10 }
 0x72c   : > { %v3739_v11 = vpop.eup %3738 }
 0x72d   : > { %v2129_v12 = vsel %vm1131_vm3, %v3739_v11, 0.0 }
 0x72e   : > { %2130 = vadd.xlane.f32.xlu1 %v2129_v12 }
 0x73f   : > { %2371 = vrot.lane.b32.xlu1 %v4344_v22, %s3945_s4 }
 0x740   : > { %2136 = vrot.lane.b32.xlu0 %v4391_v48, %s3944_s22 }
 0x744   : > { %2212 = vrot.lane.b32.xlu0 %v4393_v49, %s3944_s22 }
 0x748   : > { %2373 = vrot.lane.b32.xlu0 %v4338_v17, %s3945_s4  ;;  %v4488_v17 = vld [vmem:[%s4716_s6 + $0x8] sm:$0xff]  }
 0x749   : > { %v3405_v22 = vunpack.c.l.bf16 %v4488_v17 }
 0x74c   : > { %2451 = vrot.lane.b32.xlu0 %v4340_v20, %s3945_s4 }
 0x750   : > { %2449 = vrot.lane.b32.xlu0 %v4351_v23, %s3945_s4 }
 0x755   : > { %v1711_v13 = vpop.f32.mrb[8].mxu0 }
 0x756   : > { %v3527_v14 = vpop.f32.mrb[9].mxu0  ;;  %3535 = vmatprep.mubr.msk.f32.mxu0 %vm1131_vm3, %v1711_v13 }
 0x757   : > { %3536 = vmatmul.mubr.msk.f32.vlgmr.msra.gmra.mrb[10].mxu0 %vm1131_vm3, %v1788_v46 }
 0x758   : > { %3540 = vmatprep.mubr.msk.f32.mxu0 %vm1131_vm3, %v4433_v15  ;;  %3539 = vmatpush3.msra.mxu0 %v3401_v62 }
 0x759   : > { %3553 = vmatprep.subr.mxu0 %v3941_v3 }
 0x75f   : > { %3541 = vmatmul.mubr.msk.f32.vlgmr.msra.gmra.mrb[10].mxu0 %vm1131_vm3, %v4427_v2 }
 0x760   : > { %3555 = vmatprep.mubr.msk.f32.mxu0 %vm3942_vm1, %v3941_v3 }
 0x7b7   : > { %v2128_v20 = vpop.xlane.xlu0 %2127 }
 0x7b8   : > { %3740 = vrcp.f32 %v2128_v20 }
 0x7bb   : > { %v2131_v23 = vpop.xlane.xlu1 %2130  ;;  %v2137_v16 = vpop.permute.xlu0 %2136 }
 0x7bc   : > { %3742 = vrcp.f32 %v2131_v23  ;;  %3554 = vmatpush3.msra.mxu0 %v2137_v16 }
 0x7bd   : > { %3563 = vmatprep.subr.mxu0 %v3405_v22 }
 0x7bf   : > { %v2213_v15 = vpop.permute.xlu0 %2212  ;;  %v2372_v25 = vpop.permute.xlu1 %2371 }
 0x7c0   : > { %3559 = vmatpush3.msra.mxu1 %v2213_v15 }
 0x7c1   : > { %3568 = vmatprep.subr.mxu1 %v3941_v3 }
 0x7c2   : > { %v3741_v2 = vpop.eup %3740 }
 0x7c3   : > { %v2134_v18 = vmul.f32 %v3741_v2, %v3737_v9  ;;  %v2374_v24 = vpop.permute.xlu0 %2373 }
 0x7c5   : > { %3556 = vmatmul.mubr.msk.f32.vlgmr.msra.gmra.mrb[12].mxu0 %vm1131_vm3, %v2134_v18  ;;  %v3714_v18 = vld [vmem:[%s736_s29] sm:$0xff]  }
 0x7c6   : > { %v3743_v19 = vpop.eup %3742  ;;  %3564 = vmatpush3.msra.mxu0 %v3405_v22 }
 0x7c7   : > { %v2135_v21 = vmul.f32 %v3743_v19, %v3739_v11  ;;  %3573 = vmatprep.subr.mxu0 %v3941_v3  ;;  %v2452_v28 = vpop.permute.xlu0 %2451  ;;  %v3715_v19 = vld [vmem:[%s736_s29 + $0x8] sm:$0xff]  }
 0x7c9   : > { %3561 = vmatmul.mubr.msk.f32.vlgmr.msra.gmra.mrb[22].mxu1 %vm1131_vm3, %v2135_v21  ;;  %v3716_v21 = vld [vmem:[%s4288_s27] sm:$0xff]  }
 0x7ca   : > { %3569 = vmatpush3.xpose.msk.msra.mxu1 %vm1131_vm3, %v2374_v24  ;;  %3570 = vmatprep.mubr.msk.f32.mxu1 %vm3942_vm1, %v3941_v3  ;;  %v3717_v24 = vld [vmem:[%s4288_s27 + $0x8] sm:$0xff]  }
 0x7cb   : > { %3578 = vmatprep.subr.mxu1 %v3941_v3  ;;  %v2450_v32 = vpop.permute.xlu0 %2449 }
 0x7cd   : > { %3571 = vmatmul.mubr.msk.f32.vlgmr.msra.gmra.mrb[24].mxu1 %vm1131_vm3, %v2372_v25 }
 0x7ce   : > { %3580 = vmatprep.mubr.msk.f32.mxu1 %vm3942_vm1, %v3941_v3 }
 0x898   : > { %v2208_v26 = vpop.f32.mrb[12].mxu0 }
 0x899   : > { %v3557_v27 = vpop.f32.mrb[13].mxu0  ;;  %3565 = vmatprep.mubr.msk.f32.mxu0 %vm1131_vm3, %v2208_v26 }
 0x89c   : > { %v2284_v30 = vpop.f32.mrb[22].mxu1 }
 0x89d   : > { %v3562_v31 = vpop.f32.mrb[23].mxu1  ;;  %3566 = vmatmul.mubr.msk.f32.vlgmr.msra.gmra.mrb[10].mxu0 %vm1131_vm3, %v2284_v30 }
 0x89e   : > { %3574 = vmatpush3.xpose.msk.msra.mxu0 %vm1131_vm3, %v2452_v28  ;;  %3575 = vmatprep.mubr.msk.f32.mxu0 %vm3942_vm1, %v3941_v3 }
 0x89f   : > { %3583 = vmatprep.subr.mxu0 %v3941_v3 }
 0x8a0   : > { %v2445_v33 = vpop.f32.mrb[24].mxu1 }
 0x8a1   : > { %v2527_v34 = vmul.f32 0.35355338, %v2445_v33  ;;  %v3572_v35 = vpop.f32.mrb[25].mxu1  ;;  %3576 = vmatmul.mubr.msk.f32.vlgmr.msra.gmra.mrb[14].mxu0 %vm1131_vm3, %v2450_v32 }
 0x8a2   : > { %3585 = vmatprep.mubr.msk.f32.mxu0 %vm3942_vm1, %v3941_v3 }
 0x8a3   : > { %v2529_v36 = vadd.f32 %v4381_v38, %v2527_v34  ;;  %v3375_v34 = vld [vmem:[%s4719_s8] ss:$0 sm:$0xff] }
 0x8a5   : > { %v2531_v37 = vsel %vm1131_vm3, %v2529_v36, -inf }
 0x8a6   : > { %2532 = vmax.xlane.f32.xlu0 %v2531_v37 }
 0x933   : > { %v2533_v39 = vpop.xlane.xlu0 %2532 }
 0x934   : > { %v2537_v40 = vsub.f32 %v2529_v36, %v2533_v39  ;;  %v3376_v39 = vld [vmem:[%s4721_s0] ss:$0 sm:$0xff] }
 0x936   : > { %v2539_v41 = vmul.f32 1.442695, %v2537_v40 }
 0x938   : > { %3744 = vpow2.f32 %v2539_v41 }
 0x942   : > { %v3745_v42 = vpop.eup %3744 }
 0x943   : > { %v2543_v43 = vsel %vm1131_vm3, %v3745_v42, 0.0 }
 0x944   : > { %2544 = vadd.xlane.f32.xlu0 %v2543_v43 }
 0x974   : > { %v2523_v44 = vpop.f32.mrb[14].mxu0 }
 0x975   : > { %v2528_v45 = vmul.f32 0.35355338, %v2523_v44  ;;  %v3577_v46 = vpop.f32.mrb[15].mxu0  ;;  %v3718_v44 = vld [vmem:[%s4288_s27 + $0x10] sm:$0xff]  }
 0x976   : > { %v3377_v46 = vld [vmem:[%s884_s25] ss:$0 sm:$0xff] }
 0x977   : > { %v2530_v47 = vadd.f32 %v4374_v29, %v2528_v45  ;;  %v3719_v45 = vld [vmem:[%s4288_s27 + $0x18] sm:$0xff]  }
 0x979   : > { %v2534_v50 = vsel %vm1131_vm3, %v2530_v47, -inf }
 0x97a   : > { %2535 = vmax.xlane.f32.xlu1 %v2534_v50 }
 0x98b   : > { %2629 = vrot.lane.b32.xlu1 %v4393_v49, %s3945_s4 }
 0x9d1   : > { %v2545_v29 = vpop.xlane.xlu0 %2544 }
 0xa07   : > { %v2536_v38 = vpop.xlane.xlu1 %2535 }
 0xa08   : > { %v2538_v51 = vsub.f32 %v2530_v47, %v2536_v38 }
 0xa0a   : > { %v2541_v52 = vmul.f32 1.442695, %v2538_v51 }
 0xa0b   : > { %v2630_v53 = vpop.permute.xlu1 %2629 }
 0xa0c   : > { %3746 = vpow2.f32 %v2541_v52  ;;  %3584 = vmatpush3.msra.mxu0 %v2630_v53 }
 0xa0d   : > { %3748 = vrcp.f32 %v2545_v29 }
 0xa16   : > { %v3747_v54 = vpop.eup %3746 }
 0xa17   : > { %v2546_v55 = vsel %vm1131_vm3, %v3747_v54, 0.0  ;;  %v3749_v57 = vpop.eup %3748 }
 0xa18   : > { %2547 = vadd.xlane.f32.xlu0 %v2546_v55  ;;  %v2551_v58 = vmul.f32 %v3749_v57, %v3745_v42 }
 0xa2e   : > { %2553 = vrot.lane.b32.xlu0 %v4391_v48, %s3945_s4  ;;  %v3406_v48 = vunpack.c.h.bf16 %v4488_v17 }
 0xa30   : > { %3588 = vmatprep.subr.mxu0 %v3406_v48 }
 0xaa5   : > { %v2548_v56 = vpop.xlane.xlu0 %2547 }
 0xaa6   : > { %3750 = vrcp.f32 %v2548_v56 }
 0xaa9   : > { %v2554_v49 = vpop.permute.xlu0 %2553 }
 0xaaa   : > { %3579 = vmatpush3.msra.mxu1 %v2554_v49 }
 0xaab   : > { %3581 = vmatmul.mubr.msk.f32.vlgmr.msra.gmra.mrb[26].mxu1 %vm1131_vm3, %v2551_v58  ;;  %3593 = vmatprep.subr.bf16.mxu1 %v3941_v3 }
 0xaac   : > { %3597 = vmatprep.mubr.msk.bf16.mxu1 %vm3942_vm1, %v3941_v3  ;;  %3594 = vmatpush3.bf16.msra.mxu1 %v3714_v18  ;;  %v3388_v18 = vld [vmem:[%s898_s11] ss:$0 sm:$0xff] }
 0xaad   : > { %3595 = vmatprep.subr.bf16.mxu1 %v3941_v3 }
 0xab0   : > { %v3751_v59 = vpop.eup %3750  ;;  %3596 = vmatpush3.bf16.msra.mxu1 %v3715_v19 }
 0xab1   : > { %v2552_v60 = vmul.f32 %v3751_v59, %v3747_v54 }
 0xab3   : > { %3586 = vmatmul.mubr.msk.f32.vlgmr.msra.gmra.mrb[16].mxu0 %vm1131_vm3, %v2552_v60 }
 0xab4   : > { %3589 = vmatpush3.msra.mxu0 %v3406_v48 }
 0xab5   : > { %3601 = vmatprep.subr.bf16.mxu0 %v3941_v3 }
 0xb7e   : > { %v2625_v61 = vpop.f32.mrb[26].mxu1 }
 0xb7f   : > { %v3582_v62 = vpop.f32.mrb[27].mxu1  ;;  %3590 = vmatprep.mubr.msk.f32.mxu0 %vm1131_vm3, %v2625_v61 }
 0xb86   : > { %v2701_v63 = vpop.f32.mrb[16].mxu0 }
 0xb87   : > { %v3587_v0 = vpop.f32.mrb[17].mxu0  ;;  %3591 = vmatmul.mubr.msk.f32.vlgmr.msra.gmra.mrb[10].mxu0 %vm1131_vm3, %v2701_v63 }
 0xb88   : > { %3609 = vmatprep.mubr.msk.bf16.mxu0 %vm3942_vm1, %v3941_v3  ;;  %3602 = vmatpush3.bf16.msra.mxu0 %v3716_v21 }
 0xb89   : > { %3603 = vmatprep.subr.bf16.mxu0 %v3941_v3 }
 0xb8c   : > { %3604 = vmatpush3.bf16.msra.mxu0 %v3717_v24 }
 0xb8d   : > { %3605 = vmatprep.subr.bf16.mxu0 %v3941_v3 }
 0xb90   : > { %3606 = vmatpush3.bf16.msra.mxu0 %v3718_v44 }
 0xb91   : > { %3607 = vmatprep.subr.bf16.mxu0 %v3941_v3  ;;  %v3381_v3 = vld [vmem:[%s892_s21] ss:$0 sm:$0xff]  ;;  %s4723_s21 = sld [smem:[#allocation18_spill]] }
 0xb94   : > { %3608 = vmatpush3.bf16.msra.mxu0 %v3719_v45 }
 0xb97   : > { %p3645_p1 = scmp.eq.s32.totalorder %s4723_s21, 1 }
 0xc5a   : > { %v3592_v4 = vpop.f32.mrb[10].mxu0 }
 0xc5b   : > { %v2796_v7 = vadd.f32 %v3592_v4, %v3374_v1  ;;  %v2777_v8 = vpop.f32.mrb[11].mxu0 }
 0xc5c   : > { %v2795_v9 = vadd.f32 %v3374_v1, %v2777_v8 }
 0xc5d   : > { %v2798_v10 = vadd.f32 %v2796_v7, %v4310_v6 }
 0xc5e   : > { %v2797_v11 = vadd.f32 %v2795_v9, %v4308_v5 }
 0xc5f   : > { %v2802_v12 = vsel %vm938_vm2, %v2798_v10, 0.0 }
 0xc60   : > { %2803 = vadd.xlane.f32.xlu1 %v2802_v12  ;;  %v2799_v13 = vsel %vm938_vm2, %v2797_v11, 0.0 }
 0xc61   : > { %2800 = vadd.xlane.f32.xlu0 %v2799_v13 }
 0xced   : > { %v2804_v14 = vpop.xlane.xlu1 %2803 }
 0xcee   : > { %v2807_v17 = vmul.f32 0.03125, %v2804_v14  ;;  %v2801_v20 = vpop.xlane.xlu0 %2800 }
 0xcef   : > { %v2806_v22 = vmul.f32 0.03125, %v2801_v20 }
 0xcf0   : > { %v2809_v23 = vsub.f32 %v2798_v10, %v2807_v17 }
 0xcf1   : > { %v2808_v16 = vsub.f32 %v2797_v11, %v2806_v22 }
 0xcf2   : > { %v2811_v5 = vmul.f32 %v2809_v23, %v2809_v23 }
 0xcf3   : > { %v2810_v15 = vmul.f32 %v2808_v16, %v2808_v16 }
 0xcf4   : > { %v2815_v2 = vsel %vm938_vm2, %v2811_v5, 0.0 }
 0xcf5   : > { %v2812_v6 = vsel %vm938_vm2, %v2810_v15, 0.0 }
 0xcf6   : > { %2813 = vadd.xlane.f32.xlu0 %v2812_v6  ;;  %v3387_v6 = vld [vmem:[%s895_s10] ss:$0 sm:$0xff]  ;;  %s3848_s10 = scalar_lea.vmem %s3057_s24, 256 }
 0xcf7   : > { %p3849_p6 = scmp.ne.s32.totalorder %s3057_s24, %s3848_s10  ;;  %p3856_p12 = scmp.lt.s32.totalorder %s3848_s10, %s3848_s10 }
 0xcf9   : > { %p3850_p4 = pnand %p3849_p6, %p3645_p1  ;;  %p3857_p10 = por %p3856_p12, %p3855_p9 }
 0xcfa   : > { %2816 = vadd.xlane.f32.xlu0 %v2815_v2 }
 0xcfb   : > { %p3851_p7 = pneg %p3850_p4 }
 0xcfd   : > { %p3858_p0 = pnand %p3857_p10, %p3851_p7 }
 0xd83   : > { %v2814_v25 = vpop.xlane.xlu0 %2813 }
 0xd84   : > { %v2818_v26 = vmul.f32 0.03125, %v2814_v25 }
 0xd86   : > { %v2820_v27 = vadd.f32 1e-05, %v2818_v26 }
 0xd87   : > { %v2817_v28 = vpop.xlane.xlu0 %2816 }
 0xd88   : > { %3752 = vrsqrt.f32 %v2820_v27  ;;  %v2819_v30 = vmul.f32 0.03125, %v2817_v28 }
 0xd8a   : > { %v2821_v31 = vadd.f32 1e-05, %v2819_v30 }
 0xd8c   : > { %3754 = vrsqrt.f32 %v2821_v31 }
 0xd92   : > { %v3753_v32 = vpop.eup %3752 }
 0xd93   : > { %v2824_v33 = vmul.f32 %v3753_v32, %v2808_v16 }
 0xd95   : > { %v2833_v36 = vmul.f32 %v3375_v34, %v2824_v33 }
 0xd96   : > { %v3755_v35 = vpop.eup %3754 }
 0xd97   : > { %v2825_v37 = vmul.f32 %v3755_v35, %v2809_v23  ;;  %v2842_v41 = vadd.f32 %v3376_v39, %v2833_v36 }
 0xd99   : > { %v2834_v40 = vmul.f32 %v3375_v34, %v2825_v37 }
 0xd9b   : > { %v2843_v42 = vadd.f32 %v3376_v39, %v2834_v40 }
 0xd9d   : > { %v2844_v43 = vpack.c.bf16 %v2843_v42, %v2842_v41 }
 0xd9f   : > { %3598 = vmatmul.mubr.msk.bf16.vlgmr.msra.gmra.mrb[28].mxu1 %vm938_vm2, %v2844_v43 }
 0xe72   : > { %v2905_v47 = vpop.f32.mrb[28].mxu1 }
 0xe73   : > { %v2906_v50 = vadd.f32 %v3377_v46, %v2905_v47  ;;  %v3599_v38 = vpop.f32.mrb[29].mxu1 }
 0xe74   : > { %v2908_v51 = vpop.f32.mrb[30].mxu1 }
 0xe75   : > { %v2909_v52 = vadd.f32 %v3377_v46, %v2908_v51  ;;  %v3600_v53 = vpop.f32.mrb[31].mxu1  ;;  %v2912_v54 = vmax.f32 %v2906_v50, 0.0 }
 0xe77   : > { %v2913_v55 = vmax.f32 %v2909_v52, 0.0 }
 0xe79   : > { %v2914_v29 = vpack.c.bf16 %v2913_v55, %v2912_v54 }
 0xe7b   : > { %3610 = vmatmul.mubr.msk.bf16.vlgmr.msra.gmra.mrb[20].mxu0 %vm2954_vm4, %v2914_v29 }
 0xf4e   : > { %v2992_v56 = vpop.f32.mrb[20].mxu0 }
 0xf4f   : > { %v2993_v57 = vadd.f32 %v3381_v3, %v2992_v56  ;;  %v3611_v58 = vpop.f32.mrb[21].mxu0 }
 0xf50   : > { %v2995_v49 = vpop.f32.mrb[22].mxu0 }
 0xf51   : > { %v2996_v59 = vadd.f32 %v3381_v3, %v2995_v49  ;;  %v3612_v60 = vpop.f32.mrb[23].mxu0  ;;  %v2999_v48 = vadd.f32 %v2993_v57, %v2842_v41 }
 0xf53   : > { %v3001_v61 = vsel %vm938_vm2, %v2999_v48, 0.0  ;;  %v3000_v62 = vadd.f32 %v2996_v59, %v2843_v42 }
 0xf54   : > { %3002 = vadd.xlane.f32.xlu0 %v3001_v61 }
 0xf55   : > { %v3004_v63 = vsel %vm938_vm2, %v3000_v62, 0.0 }
 0xf56   : > { %3005 = vadd.xlane.f32.xlu1 %v3004_v63 }
 0xfe1   : > { %v3003_v0 = vpop.xlane.xlu0 %3002 }
 0xfe2   : > { %v3007_v1 = vmul.f32 0.03125, %v3003_v0 }
 0xfe3   : > { %v3006_v4 = vpop.xlane.xlu1 %3005 }
 0xfe4   : > { %v3009_v7 = vsub.f32 %v2999_v48, %v3007_v1  ;;  %v3008_v8 = vmul.f32 0.03125, %v3006_v4 }
 0xfe6   : > { %v3010_v9 = vsub.f32 %v3000_v62, %v3008_v8  ;;  %v3011_v10 = vmul.f32 %v3009_v7, %v3009_v7 }
 0xfe8   : > { %v3013_v11 = vsel %vm938_vm2, %v3011_v10, 0.0  ;;  %v3012_v12 = vmul.f32 %v3010_v9, %v3010_v9 }
 0xfe9   : > { %3014 = vadd.xlane.f32.xlu0 %v3013_v11 }
 0xfea   : > { %v3016_v13 = vsel %vm938_vm2, %v3012_v12, 0.0 }
 0xfeb   : > { %3017 = vadd.xlane.f32.xlu1 %v3016_v13 }
0x1076   : > { %v3015_v14 = vpop.xlane.xlu0 %3014 }
0x1077   : > { %v3019_v17 = vmul.f32 0.03125, %v3015_v14 }
0x1078   : > { %v3018_v20 = vpop.xlane.xlu1 %3017 }
0x1079   : > { %v3021_v22 = vadd.f32 1e-05, %v3019_v17  ;;  %v3020_v23 = vmul.f32 0.03125, %v3018_v20 }
0x107b   : > { %3756 = vrsqrt.f32 %v3021_v22  ;;  %v3022_v16 = vadd.f32 1e-05, %v3020_v23 }
0x107d   : > { %3758 = vrsqrt.f32 %v3022_v16 }
0x1085   : > { %v3757_v15 = vpop.eup %3756 }
0x1086   : > { %v3025_v5 = vmul.f32 %v3757_v15, %v3009_v7 }
0x1087   : > { %v3759_v2 = vpop.eup %3758 }
0x1088   : > { %v3034_v19 = vmul.f32 %v3387_v6, %v3025_v5  ;;  %v3026_v21 = vmul.f32 %v3759_v2, %v3010_v9 }
0x108a   : > { %v3035_v24 = vmul.f32 %v3387_v6, %v3026_v21  ;;  %v3043_v25 = vadd.f32 %v3388_v18, %v3034_v19 }
0x108c   : > { %v3044_v26 = vadd.f32 %v3388_v18, %v3035_v24  ;;  %3045 = vst.msk [vmem:[#allocation8] sm:$0xff] %vm938_vm2, %v3043_v25 }
0x108e   : > { %3046 = vst.msk [vmem:[#allocation8 + $0x8] sm:$0xff] %vm938_vm2, %v3044_v26 }
0x108f   : > { %3861 = shalt.err (!%p3858_p0)
}
0x1090   : > { %s4726_s29 = sld [smem:[#allocation31_spill]] }
0x1096   : > { %s4727_s2 = smov %s4726_s29  ;;  %s3862_s8 = scalar_lea.hbm %s4726_s29, 256 }
0x1097   : > { %p3863_p8 = scmp.ne.s32.totalorder %s4727_s2, %s3862_s8  ;;  %p3868_p5 = scmp.lt.u32.totalorder %s3862_s8, %s4727_s2 }
0x1099   : > { %p3864_p13 = pnand %p3863_p8, %p3645_p1 }
0x109b   : > { %p3865_p2 = pneg %p3864_p13 }
0x109d   : > { %p3870_p3 = pnand %p3868_p5, %p3865_p2 }
0x109f   : > { %3873 = shalt.err (!%p3870_p3)
}
0x10a0   : > { %s3947_s1 = smov 128   ;;  %s3948_s15 = smov 8  }
0x10a1   : > { %3628 = dma.vmem_to_hbm [thread:$0]  (%p3645_p1), %s3057_s24, 256, %s4727_s2, [#allocation4], %s3947_s1, %s3947_s1, %s3948_s15  }
0x10a2   : > { %3907 = dma.done.wait (%p3645_p1), [#allocation4], 256  }
0x10a3   : > { %3909 = vsyncadd (%p3645_p1), [#allocation4], 4294967040 }
0x10a4 PF: > { %s4728_s27 = sld [smem:[#allocation15_spill]]  ;;  %s4730_s28 = sld [smem:[#allocation13_spill]] }
0x10a5   : > { %s4731_s29 = sld [smem:[#allocation17_spill]]  ;;  %s4732_s30 = sld [smem:[#allocation14_spill]] }
0x10a6   : > { %s4733_s0 = sld [smem:[#allocation16_spill]] }
0x10aa   : > { %s33_s19 = sadd.s32 1, %s4728_s27   ;;  %s4729_s27 = sld [smem:[#allocation12_spill]] }
0x10ab   : > { %p30_p11 = scmp.ge.s32.totalorder %s33_s19, 4  }
0x10ad   :  { %32 = sbr.rel (!%p30_p11) target bundleno = 20 (0x14), region = 196 }
0x10b4   :  { %3072 = vsyncpa [#allocation3], 1 }
0x10b5   :  { %3074 = vsyncpa [#allocation3 + $0x1], 1 }
0x10b6   :  { %3075 = vsyncpa [#allocation6], 1 }
0x10b7   :  { %3077 = vsyncpa [#allocation6 + $0x1], 1 }
0x10b8   :  { %3078 = vsyncpa [#allocation4], 1 }
0x10b9   :  { %3080 = vsyncpa [#allocation4 + $0x1], 1 }

</bundles_post_ra>
